<compile_context>
chip_gen: v7x
topology: tpu7x:2x2x1
jax: 0.10.0
libtpu: 0.0.40
codegen_flags: <defaults>
</compile_context>

<pallas_src>
from functools import partial

import jax
import jax.numpy as jnp
from jax.experimental import pallas as pl
from jax.experimental.pallas import tpu as pltpu

# ---- static model dimensions -------------------------------------------------
SIZE = 16        # vocab size == embedding dim ("size" in the torch module)
OUT = 4          # number of classes ("out")
B = 2            # batch
L = 400          # sequence length (L // 4 == 100 == AvgPool1d kernel_size)
C1 = 128         # conv channels
K1, K2 = 3, 5    # conv kernel sizes
L2 = L // 2      # 200 after first max-pool
L4 = L // 4      # 100 after second max-pool
PAD = 8          # aligned zero-halo rows on each side of the pooled scratch


def make_kernel(bb):
    """Kernel processing a block of `bb` batch elements per grid step."""

    def model_kernel(x_ref, wcv_ref, wfp_ref, out_ref, pooled_sc, h2_sc):
        """
        x_ref   : (bb, 2*L2, K1*SIZE) bf16  stacked conv1 taps; rows [0:L2) are the
                                            EVEN conv-output positions, [L2:2*L2) ODD.
        wcv_ref : (K1*SIZE + K2*C1, C1) bf16  [w1' (48,128) ; w2' (640,128)]  (BN-scale folded)
        wfp_ref : (C1 + 8, C1) f32           rows [0:128) = linear weight (zero-padded,
                                             1/L4 folded); row 128 = t1', 129 = t2',
                                             130 = linear bias (lane-padded).
        out_ref : (bb, 1, C1) f32            logits padded to 128 lanes (first OUT real)
        pooled_sc : (L2 + 2*PAD, C1) f32     zero-haloed pool1 output scratch
        h2_sc     : (L2, C1) f32             conv2 pre-activation scratch (for pool2)
        """
        # TODO(synk): Dropout(p=0.4) is the identity in eval mode; training-mode
        # stochastic dropout (torch RNG semantics) is not implemented.

        # ---- shared weights / per-channel params (one load, reused per batch) --
        wl = wfp_ref[pl.ds(0, C1), :]                        # (128,128) f32
        pp = wfp_ref[pl.ds(C1, 8), :]                        # (8,128)   f32
        t1p, t2p, blp = pp[0:1, :], pp[1:2, :], pp[2:3, :]
        w1 = wcv_ref[pl.ds(0, K1 * SIZE), :]                 # (48,128)  bf16
        w2 = wcv_ref[pl.ds(K1 * SIZE, K2 * C1), :]           # (640,128) bf16

        # Zero the scratch halo every step (cheap, aligned).  NOTE: cannot be
        # gated on program_id==0 — with a "parallel" batch grid each core owns
        # its own scratch and would skip the init.
        zpad = jnp.zeros((PAD, C1), jnp.float32)
        pooled_sc[pl.ds(0, PAD), :] = zpad
        pooled_sc[pl.ds(PAD + L2, PAD), :] = zpad

        for b in range(bb):  # static unroll (bb is 1 or 2)
            # ---- Conv1d(16->128,k=3,pad=1)+BN+ReLU+MaxPool(2): one MXU dot ----
            # Taps are pre-stacked along lanes in the wrapper; even/odd output
            # positions are pre-separated, so maxpool(2) is a plain vreg max.
            c = jnp.dot(x_ref[b], w1,
                        preferred_element_type=jnp.float32)          # (2*L2,128)
            # maxpool(relu(x + t)) == relu(max(x_even, x_odd) + t)   (monotone)
            pooled = jnp.maximum(jnp.maximum(c[:L2], c[L2:]) + t1p, 0.0)

            # ---- Conv1d(128->128,k=5,pad=2)+BN: single K=640 contraction ------
            pooled_sc[pl.ds(PAD, L2), :] = pooled
            taps = jnp.concatenate(
                [pooled_sc[pl.ds(PAD + k - 2, L2), :] for k in range(K2)],
                axis=1).astype(jnp.bfloat16)                          # (L2, 640)
            acc2 = jnp.dot(taps, w2,
                           preferred_element_type=jnp.float32)        # (L2, 128)

            # ---- MaxPool1d(2) before bias/ReLU (monotone), then global mean ---
            h2_sc[...] = acc2
            m2 = jnp.maximum(h2_sc[pl.ds(0, L4, 2), :],
                             h2_sc[pl.ds(1, L4, 2), :])               # (L4, 128)
            p2 = jnp.maximum(m2 + t2p, 0.0)
            gsum = jnp.sum(p2, axis=0, keepdims=True)                 # (1, 128); 1/L4 in wl

            # ---- Flatten + Linear(128 -> OUT), lane-padded to 128 -------------
            out_ref[b] = jnp.dot(gsum, wl,
                                 preferred_element_type=jnp.float32) + blp

    return model_kernel


def _default_batch_block():
    """Single-TC chips (v5e/v6e): fold the whole batch into one grid step.
    Multi-core chips (v7x, megacore): one batch element per core via a
    'parallel' batch grid.  Both settings are correct on every chip; this is
    purely a perf heuristic."""
    try:
        kind = jax.devices()[0].device_kind.lower()
    except Exception:
        return 1
    single_tc = any(t in kind for t in
                    ("v5e", "v5 lite", "v5lite", "v6e", "v6 lite", "v6lite"))
    return B if single_tc else 1


def _fold_params(params):
    """Offline folding: BN scale into conv weights, conv bias into BN shift,
    1/L4 into the linear weight; pack weights into two dense blocks."""
    f32 = jnp.float32
    s1, t1, b1 = params["s1"], params["t1"], params["b1"]
    s2, t2, b2 = params["s2"], params["t2"], params["b2"]
    w1f = (params["w1"] * s1).astype(f32)                    # (K1,SIZE,C1)
    t1p = b1 * s1 + t1
    w2f = (params["w2"] * s2).astype(f32)                    # (K2,C1,C1)
    t2p = b2 * s2 + t2

    wcv = jnp.concatenate([w1f.reshape(K1 * SIZE, C1),
                           w2f.reshape(K2 * C1, C1)],
                          axis=0).astype(jnp.bfloat16)       # (688,128) bf16

    wl_scaled = jnp.zeros((C1, C1), f32).at[:, :OUT].set(params["wl"] * (1.0 / L4))
    pp = (jnp.zeros((8, C1), f32)
          .at[0, :].set(t1p[0])
          .at[1, :].set(t2p[0])
          .at[2, :OUT].set(params["bl"][0]))
    wfp = jnp.concatenate([wl_scaled, pp], axis=0)           # (136,128) f32
    return wcv, wfp


def _stack_conv1_taps(token_ids, emb_table):
    """Gather raw 16-dim embeddings and stack the K1=3 conv taps along lanes,
    de-interleaved into even/odd conv-output positions (all of this fuses into
    the XLA gather).  Row SIZE of the extended table is the conv zero padding."""
    f32 = jnp.float32
    emb_ext = jnp.concatenate([emb_table.astype(f32),
                               jnp.zeros((1, SIZE), f32)], axis=0)       # (SIZE+1, SIZE)
    tok_pad = jnp.pad(token_ids, ((0, 0), (1, 1)), constant_values=SIZE)  # (B, L+2)
    E = emb_ext[tok_pad[:, 0::2]]                                         # (B, L2+1, SIZE)
    O = emb_ext[tok_pad[:, 1::2]]                                         # (B, L2+1, SIZE)
    # conv output at even position 2m uses emb_p[2m, 2m+1, 2m+2] = E[m],O[m],E[m+1]
    xe = jnp.concatenate([E[:, :L2], O[:, :L2], E[:, 1:]], axis=-1)       # (B, L2, 48)
    # conv output at odd position 2m+1 uses O[m], E[m+1], O[m+1]
    xo = jnp.concatenate([O[:, :L2], E[:, 1:], O[:, 1:]], axis=-1)        # (B, L2, 48)
    return jnp.concatenate([xe, xo], axis=1).astype(jnp.bfloat16)         # (B, 2*L2, 48)


@partial(jax.jit, static_argnums=(2,))
def _forward_impl(token_ids, params, batch_block):
    bb = batch_block
    assert B % bb == 0
    wcv, wfp = _fold_params(params)
    x = _stack_conv1_taps(token_ids, params["emb_table"])

    out = pl.pallas_call(
        make_kernel(bb),
        out_shape=jax.ShapeDtypeStruct((B, 1, C1), jnp.float32),
        grid_spec=pltpu.PrefetchScalarGridSpec(
            num_scalar_prefetch=0,
            grid=(B // bb,),
            in_specs=[
                pl.BlockSpec((bb, 2 * L2, K1 * SIZE), lambda g: (g, 0, 0)),  # taps
                pl.BlockSpec((K1 * SIZE + K2 * C1, C1), lambda g: (0, 0)),   # conv w
                pl.BlockSpec((C1 + 8, C1), lambda g: (0, 0)),                # lin w + params
            ],
            out_specs=pl.BlockSpec((bb, 1, C1), lambda g: (g, 0, 0)),
            scratch_shapes=[
                pltpu.VMEM((L2 + 2 * PAD, C1), jnp.float32),   # pool1 output (haloed)
                pltpu.VMEM((L2, C1), jnp.float32),             # conv2 pre-activation
            ],
        ),
        compiler_params=pltpu.CompilerParams(
            dimension_semantics=("parallel",) if bb == 1 else ("arbitrary",)),
    )(x, wcv, wfp)
    return out[:, 0, :OUT]                                     # (B, OUT)


def model_forward(token_ids, params, batch_block=None):
    """token_ids: (B, L) int32 in [0, SIZE)."""
    if batch_block is None:
        batch_block = _default_batch_block()
    return _forward_impl(token_ids, params, batch_block)


def reference_forward(token_ids, params):
    """Pure-JAX f32 reference with the original (unfolded) math."""
    emb = params["emb_table"][token_ids]
    emb_p = jnp.pad(emb, ((0, 0), (1, 1), (0, 0))).astype(jnp.float32)

    acc1 = jnp.zeros((B, L, C1), jnp.float32)
    for k in range(K1):
        acc1 = acc1 + jnp.einsum("blc,cd->bld", emb_p[:, k:k + L, :],
                                 params["w1"][k],
                                 preferred_element_type=jnp.float32)
    h1 = jnp.maximum((acc1 + params["b1"]) * params["s1"] + params["t1"], 0.0)
    p1 = jnp.max(h1.reshape(B, L2, 2, C1), axis=2)            # MaxPool1d(2)

    p1p = jnp.pad(p1, ((0, 0), (2, 2), (0, 0)))
    acc2 = jnp.zeros((B, L2, C1), jnp.float32)
    for k in range(K2):
        acc2 = acc2 + jnp.einsum("blc,cd->bld", p1p[:, k:k + L2, :],
                                 params["w2"][k],
                                 preferred_element_type=jnp.float32)
    h2 = jnp.maximum((acc2 + params["b2"]) * params["s2"] + params["t2"], 0.0)
    p2 = jnp.max(h2.reshape(B, L4, 2, C1), axis=2)            # MaxPool1d(2)

    g = jnp.mean(p2, axis=1)                                  # AvgPool1d(100)
    return g @ params["wl"] + params["bl"]                    # Linear


def init_params(key):
    ks = jax.random.split(key, 14)
    eps = 1e-5

    emb_table = 0.1 * jax.random.normal(ks[0], (SIZE, SIZE), jnp.float32)
    emb_table = emb_table.at[1].set(0.0)                      # padding_idx=1

    w1 = 0.1 * jax.random.normal(ks[1], (K1, SIZE, C1), jnp.float32)
    b1 = 0.1 * jax.random.normal(ks[2], (1, C1), jnp.float32)
    g1 = jax.random.uniform(ks[3], (1, C1), jnp.float32, 0.5, 1.5)
    be1 = 0.1 * jax.random.normal(ks[4], (1, C1), jnp.float32)
    m1 = 0.1 * jax.random.normal(ks[5], (1, C1), jnp.float32)
    v1 = jax.random.uniform(ks[6], (1, C1), jnp.float32, 0.5, 1.5)
    s1 = g1 / jnp.sqrt(v1 + eps)                              # folded eval-mode BN
    t1 = be1 - m1 * s1

    w2 = 0.1 * jax.random.normal(ks[7], (K2, C1, C1), jnp.float32)
    b2 = 0.1 * jax.random.normal(ks[8], (1, C1), jnp.float32)
    g2 = jax.random.uniform(ks[9], (1, C1), jnp.float32, 0.5, 1.5)
    be2 = 0.1 * jax.random.normal(ks[10], (1, C1), jnp.float32)
    m2 = 0.1 * jax.random.normal(ks[11], (1, C1), jnp.float32)
    v2 = jax.random.uniform(ks[12], (1, C1), jnp.float32, 0.5, 1.5)
    s2 = g2 / jnp.sqrt(v2 + eps)
    t2 = be2 - m2 * s2

    kl1, kl2 = jax.random.split(ks[13])
    wl = 0.1 * jax.random.normal(kl1, (C1, OUT), jnp.float32)
    bl = 0.1 * jax.random.normal(kl2, (1, OUT), jnp.float32)

    return dict(emb_table=emb_table, w1=w1, b1=b1, s1=s1, t1=t1,
                w2=w2, b2=b2, s2=s2, t2=t2, wl=wl, bl=bl)


if __name__ == "__main__":
    key = jax.random.PRNGKey(0)
    pkey, dkey = jax.random.split(key)
    params = init_params(pkey)
    token_ids = jax.random.randint(dkey, (B, L), 0, SIZE, dtype=jnp.int32)

    out = jax.block_until_ready(model_forward(token_ids, params))
    ref = jax.block_until_ready(reference_forward(token_ids, params))

    assert out.shape == (B, OUT), out.shape
    err = float(jnp.max(jnp.abs(out - ref)))
    if err > 5e-3:
        raise AssertionError(f"Pallas kernel mismatch vs JAX reference: {err}")
    print("KERNEL_OK")
</pallas_src>

<mosaic_0001>
module attributes {stable_mosaic.version = 11 : i64} {
  func.func @model_kernel(%arg0: i32, %arg1: memref<1x400x48xbf16, #tpu.memory_space<vmem>>, %arg2: memref<688x128xbf16, #tpu.memory_space<vmem>>, %arg3: memref<136x128xf32, #tpu.memory_space<vmem>>, %arg4: memref<1x1x128xf32, #tpu.memory_space<vmem>>, %arg5: memref<216x128xf32, #tpu.memory_space<vmem>>, %arg6: memref<200x128xf32, #tpu.memory_space<vmem>>) attributes {dimension_semantics = [#tpu.dimension_semantics<parallel>], iteration_bounds = array<i64: 2>, scalar_prefetch = 0 : i64, scratch_operands = 2 : i64, tpu.core_type = #tpu.core_type<tc>, window_params = [{transform_indices = @transform_0, window_bounds = array<i64: 1, 400, 48>}, {pipeline_mode = #tpu.pipeline_mode<synchronous>, transform_indices = @transform_1, window_bounds = array<i64: 688, 128>}, {pipeline_mode = #tpu.pipeline_mode<synchronous>, transform_indices = @transform_2, window_bounds = array<i64: 136, 128>}, {transform_indices = @transform_3, window_bounds = array<i64: 1, 1, 128>}]} {
    %c0 = arith.constant 0 : index
    %c0_0 = arith.constant 0 : index
    %0 = vector.load %arg3[%c0, %c0_0] : memref<136x128xf32, #tpu.memory_space<vmem>>, vector<128x128xf32>
    %c128 = arith.constant 128 : index
    %c0_1 = arith.constant 0 : index
    %1 = vector.load %arg3[%c128, %c0_1] : memref<136x128xf32, #tpu.memory_space<vmem>>, vector<8x128xf32>
    %2 = vector.extract_strided_slice %1 {offsets = [0, 0], sizes = [1, 128], strides = [1, 1]} : vector<8x128xf32> to vector<1x128xf32>
    %3 = vector.extract_strided_slice %1 {offsets = [1, 0], sizes = [1, 128], strides = [1, 1]} : vector<8x128xf32> to vector<1x128xf32>
    %4 = vector.extract_strided_slice %1 {offsets = [2, 0], sizes = [1, 128], strides = [1, 1]} : vector<8x128xf32> to vector<1x128xf32>
    %c0_2 = arith.constant 0 : index
    %c0_3 = arith.constant 0 : index
    %5 = vector.load %arg2[%c0_2, %c0_3] : memref<688x128xbf16, #tpu.memory_space<vmem>>, vector<48x128xbf16>
    %c48 = arith.constant 48 : index
    %c0_4 = arith.constant 0 : index
    %6 = vector.load %arg2[%c48, %c0_4] : memref<688x128xbf16, #tpu.memory_space<vmem>>, vector<640x128xbf16>
    %cst = arith.constant 0.000000e+00 : f32
    %7 = vector.broadcast %cst : f32 to vector<8x128xf32>
    %c0_5 = arith.constant 0 : index
    %c0_6 = arith.constant 0 : index
    %8 = vector.load %arg5[%c0_5, %c0_6] : memref<216x128xf32, #tpu.memory_space<vmem>>, vector<8x128xf32>
    tpu.vector_store %arg5[%c0_5, %c0_6], %7 {strides = array<i32>} : memref<216x128xf32, #tpu.memory_space<vmem>>, vector<8x128xf32>,
    %c208 = arith.constant 208 : index
    %c0_7 = arith.constant 0 : index
    %9 = vector.load %arg5[%c208, %c0_7] : memref<216x128xf32, #tpu.memory_space<vmem>>, vector<8x128xf32>
    tpu.vector_store %arg5[%c208, %c0_7], %7 {strides = array<i32>} : memref<216x128xf32, #tpu.memory_space<vmem>>, vector<8x128xf32>,
    %c0_8 = arith.constant 0 : index
    %c0_9 = arith.constant 0 : index
    %c0_10 = arith.constant 0 : index
    %10 = vector.load %arg1[%c0_8, %c0_9, %c0_10] : memref<1x400x48xbf16, #tpu.memory_space<vmem>>, vector<1x400x48xbf16>
    %11 = vector.shape_cast %10 : vector<1x400x48xbf16> to vector<400x48xbf16>
    %cst_11 = arith.constant dense<0.000000e+00> : vector<400x128xf32>
    %12 = tpu.matmul %11, %5, %cst_11 {dimension_numbers = #tpu.dot_dimension_numbers<[1], [0], [0], [1], [0, 0, 1, 1], [], []>} : vector<400x48xbf16>, vector<48x128xbf16>, vector<400x128xf32> -> vector<400x128xf32>
    %13 = vector.extract_strided_slice %12 {offsets = [0, 0], sizes = [200, 128], strides = [1, 1]} : vector<400x128xf32> to vector<200x128xf32>
    %14 = vector.extract_strided_slice %12 {offsets = [200, 0], sizes = [200, 128], strides = [1, 1]} : vector<400x128xf32> to vector<200x128xf32>
    %15 = arith.maximumf %13, %14 : vector<200x128xf32>
    %16 = vector.broadcast %2 : vector<1x128xf32> to vector<200x128xf32>
    %17 = arith.addf %15, %16 : vector<200x128xf32>
    %cst_12 = arith.constant 0.000000e+00 : f32
    %18 = vector.broadcast %cst_12 : f32 to vector<200x128xf32>
    %19 = arith.maximumf %17, %18 : vector<200x128xf32>
    %c8 = arith.constant 8 : index
    %c0_13 = arith.constant 0 : index
    %20 = vector.load %arg5[%c8, %c0_13] : memref<216x128xf32, #tpu.memory_space<vmem>>, vector<200x128xf32>
    tpu.vector_store %arg5[%c8, %c0_13], %19 {strides = array<i32>} : memref<216x128xf32, #tpu.memory_space<vmem>>, vector<200x128xf32>,
    %c6 = arith.constant 6 : index
    %c0_14 = arith.constant 0 : index
    %21 = vector.load %arg5[%c6, %c0_14] : memref<216x128xf32, #tpu.memory_space<vmem>>, vector<200x128xf32>
    %c7 = arith.constant 7 : index
    %c0_15 = arith.constant 0 : index
    %22 = vector.load %arg5[%c7, %c0_15] : memref<216x128xf32, #tpu.memory_space<vmem>>, vector<200x128xf32>
    %c8_16 = arith.constant 8 : index
    %c0_17 = arith.constant 0 : index
    %23 = vector.load %arg5[%c8_16, %c0_17] : memref<216x128xf32, #tpu.memory_space<vmem>>, vector<200x128xf32>
    %c9 = arith.constant 9 : index
    %c0_18 = arith.constant 0 : index
    %24 = vector.load %arg5[%c9, %c0_18] : memref<216x128xf32, #tpu.memory_space<vmem>>, vector<200x128xf32>
    %c10 = arith.constant 10 : index
    %c0_19 = arith.constant 0 : index
    %25 = vector.load %arg5[%c10, %c0_19] : memref<216x128xf32, #tpu.memory_space<vmem>>, vector<200x128xf32>
    %26 = tpu.concatenate %21, %22, %23, %24, %25 in 1 : vector<200x128xf32>, vector<200x128xf32>, vector<200x128xf32>, vector<200x128xf32>, vector<200x128xf32> -> vector<200x640xf32>
    %27 = arith.truncf %26 : vector<200x640xf32> to vector<200x640xbf16>
    %cst_20 = arith.constant dense<0.000000e+00> : vector<200x128xf32>
    %28 = tpu.matmul %27, %6, %cst_20 {dimension_numbers = #tpu.dot_dimension_numbers<[1], [0], [0], [1], [0, 0, 1, 1], [], []>} : vector<200x640xbf16>, vector<640x128xbf16>, vector<200x128xf32> -> vector<200x128xf32>
    %c0_21 = arith.constant 0 : index
    %c0_22 = arith.constant 0 : index
    %29 = vector.load %arg6[%c0_21, %c0_22] : memref<200x128xf32, #tpu.memory_space<vmem>>, vector<200x128xf32>
    tpu.vector_store %arg6[%c0_21, %c0_22], %28 {strides = array<i32>} : memref<200x128xf32, #tpu.memory_space<vmem>>, vector<200x128xf32>,
    %c0_23 = arith.constant 0 : index
    %c0_24 = arith.constant 0 : index
    %30 = tpu.strided_load %arg6[%c0_23, %c0_24] {strides = array<i32: 2, 1>} : memref<200x128xf32, #tpu.memory_space<vmem>>, vector<100x128xf32>
    %c1 = arith.constant 1 : index
    %c0_25 = arith.constant 0 : index
    %31 = tpu.strided_load %arg6[%c1, %c0_25] {strides = array<i32: 2, 1>} : memref<200x128xf32, #tpu.memory_space<vmem>>, vector<100x128xf32>
    %32 = arith.maximumf %30, %31 : vector<100x128xf32>
    %33 = vector.broadcast %3 : vector<1x128xf32> to vector<100x128xf32>
    %34 = arith.addf %32, %33 : vector<100x128xf32>
    %cst_26 = arith.constant 0.000000e+00 : f32
    %35 = vector.broadcast %cst_26 : f32 to vector<100x128xf32>
    %36 = arith.maximumf %34, %35 : vector<100x128xf32>
    %cst_27 = arith.constant dense<0.000000e+00> : vector<128xf32>
    %37 = vector.multi_reduction <add>, %36, %cst_27 [0] : vector<100x128xf32> to vector<128xf32>
    %38 = vector.shape_cast %37 : vector<128xf32> to vector<1x128xf32>
    %cst_28 = arith.constant dense<0.000000e+00> : vector<1x128xf32>
    %39 = tpu.matmul %38, %0, %cst_28 {dimension_numbers = #tpu.dot_dimension_numbers<[1], [0], [0], [1], [0, 0, 1, 1], [], []>} : vector<1x128xf32>, vector<128x128xf32>, vector<1x128xf32> -> vector<1x128xf32>
    %40 = arith.addf %39, %4 : vector<1x128xf32>
    %c0_29 = arith.constant 0 : index
    %c0_30 = arith.constant 0 : index
    %c0_31 = arith.constant 0 : index
    %41 = vector.load %arg4[%c0_29, %c0_30, %c0_31] : memref<1x1x128xf32, #tpu.memory_space<vmem>>, vector<1x1x128xf32>
    %42 = vector.shape_cast %41 : vector<1x1x128xf32> to vector<1x128xf32>
    %43 = vector.shape_cast %40 : vector<1x128xf32> to vector<1x1x128xf32>
    tpu.vector_store %arg4[%c0_29, %c0_30, %c0_31], %43 {strides = array<i32>} : memref<1x1x128xf32, #tpu.memory_space<vmem>>, vector<1x1x128xf32>,
    return
  }
  func.func @transform_0(%arg0: i32) -> (i32, i32, i32) {
    %c0_i32 = arith.constant 0 : i32
    %c0_i32_0 = arith.constant 0 : i32
    %c0_i32_1 = arith.constant 0 : i32
    return %arg0, %c0_i32, %c0_i32_0 : i32, i32, i32
  }
  func.func @transform_1(%arg0: i32) -> (i32, i32) {
    %c0_i32 = arith.constant 0 : i32
    %c0_i32_0 = arith.constant 0 : i32
    %c0_i32_1 = arith.constant 0 : i32
    return %c0_i32, %c0_i32_0 : i32, i32
  }
  func.func @transform_2(%arg0: i32) -> (i32, i32) {
    %c0_i32 = arith.constant 0 : i32
    %c0_i32_0 = arith.constant 0 : i32
    %c0_i32_1 = arith.constant 0 : i32
    return %c0_i32, %c0_i32_0 : i32, i32
  }
  func.func @transform_3(%arg0: i32) -> (i32, i32, i32) {
    %c0_i32 = arith.constant 0 : i32
    %c0_i32_0 = arith.constant 0 : i32
    %c0_i32_1 = arith.constant 0 : i32
    return %arg0, %c0_i32, %c0_i32_0 : i32, i32, i32
  }
}

</mosaic_0001>

<bundles_post_ra>
// kernel: _forward_impl.1
= control target key start
LH: loop header
LB: loop body
LE: loop exit
PB: predicated region body
PF: predicated region fallthrough
CT: control target
= control target key end

     0   :  { %8 = vsyncpa [#allocation5], 0  ;;  %s3536_s0 = inlined_call_operand.vmem [shape: bf16[2,400,48], index: 0, kind: input, shape index: {}]   ;;  %s3537_s1 = inlined_call_operand.vmem [shape: bf16[688,128], index: 1, kind: input, shape index: {}]   ;;  %s3538_s2 = inlined_call_operand.vmem [shape: f32[136,128], index: 2, kind: input, shape index: {}]   ;;  %s3539_s3 = inlined_call_operand.hbm [shape: f32[2,1,128], index: 3, kind: output, shape index: {}]  }
   0x1   :  { %10 = vsyncpa [#allocation5 + $0x1], 0  ;;  %s2794_s12 = smov 0   ;;  %s2796_s13 = smov 0  }
   0x2   :  { %s2798_s14 = smov 0   ;;  %s2800_s15 = smov 0  }
   0x3 LB: > { %s2815_s16 = sadd.s32 4294967295, %s2768_s15   ;;  %s1999_s17 = sadd.s32 4294967294, %s2768_s15   ;;  %s2768_s15 = sphi %s2800_s15, %s3551_s15   ;;  %s2764_s14 = sphi %s2798_s14, %s3550_s14   ;;  %s2760_s13 = sphi %s2796_s13, %s3549_s13   ;;  %s2756_s12 = sphi %s2794_s12, %s3548_s12  }
   0x4   : > { %s2819_s18 = sadd.s32 1, %s2768_s15   ;;  %s91_s19 = sadd.s32 1, %s2764_s14 }
   0x5   : > { %s88_s20 = ssub.s32 %s2768_s15, %s2819_s18  ;;  %p101_p0 = scmp.ne.s32.totalorder %s2764_s14, %s2760_s13 }
   0x6   : > { %p89_p1 = scmp.eq.s32.totalorder %s88_s20, 0  ;;  %p102_p2 = scmp.eq.s32.totalorder %s2815_s16, 1 }
   0x7   : > { %p107_p3 = scmp.ne.s32.totalorder %s2760_s13, %s2756_s12  ;;  %p108_p4 = scmp.eq.s32.totalorder %s1999_s17, 1 }
   0x8   : > { %s2830_s21 = scalar_select %p89_p1, %s2764_s14, %s91_s19  }
   0x9   : > { %p2832_p5 = por %p102_p2, %p101_p0  ;;  %p2836_p6 = por %p108_p4, %p107_p3 }
   0xa   : > { %p2002_p7 = scmp.ge.s32.totalorder %s2768_s15, 1  ;;  %p140_p8 = scmp.lt.s32.totalorder %s2768_s15, 3 }
   0xc   : > { %p141_p9 = pnand %p2002_p7, %p140_p8 }
   0xe   : > { %144 = sbr.rel (%p141_p9) target bundleno = 1043 (0x413), region = 32 }
  0x15   : > { %v2636_v0 = vld [vmem:[%s3537_s1] sm:$0xff]   ;;  %v2770_v1 = vmov 0.0   ;;  %v2637_v2 = vld [vmem:[%s3537_s1 + $0x8] sm:$0xff]   ;;  %vm2771_vm0 = vmmov 0   ;;  %p163_p10 = scmp.lt.s32.totalorder %s2815_s16, 1  ;;  %v2638_v3 = vld [vmem:[%s3537_s1 + $0x10] sm:$0xff]  }
  0x16   : > { %2354 = vmatprep.subr.bf16.mxu0 %v2770_v1  ;;  %272 = vst [vmem:[#allocation2] sm:$0xff] %v2770_v1  ;;  %273 = vst [vmem:[#allocation2 + $0xd0] sm:$0xff] %v2770_v1  ;;  %2587 = vmatprep.subr.bf16.mxu1 %v2770_v1  ;;  %vm467_vm1 = vcmask 392192   ;;  %v2664_v29 = vld [vmem:[%s3537_s1 + $0x118] sm:$0xff]   ;;  %v2667_v32 = vld [vmem:[%s3537_s1 + $0x60] sm:$0xff]   ;;  %vm1848_vm2 = vcmask 1043456  }
  0x17   : > { %2355 = vmatpush3.bf16.msra.mxu0 %v2636_v0  ;;  %2360 = vmatprep.mubr.msk.bf16.mxu0 %vm2771_vm0, %v2770_v1  ;;  %s164_s28 = scalar_select %p163_p10, %s2815_s16, 1  ;;  %v2665_v30 = vld [vmem:[%s3537_s1 + $0x58] sm:$0xff]   ;;  %v2668_v33 = vld [vmem:[%s3537_s1 + $0x20] sm:$0xff]   ;;  %v2669_v35 = vld [vmem:[%s3537_s1 + $0x68] sm:$0xff]  }
  0x18   : > { %2356 = vmatprep.subr.bf16.mxu0 %v2770_v1  ;;  %2590 = vmatpush3.bf16.msra.mxu1 %v2636_v0  ;;  %v2666_v31 = vld [vmem:[%s3537_s1 + $0x18] sm:$0xff]   ;;  %v2670_v34 = vld [vmem:[%s3537_s1 + $0x120] sm:$0xff]   ;;  %v2671_v36 = vld [vmem:[%s3537_s1 + $0x28] sm:$0xff]   ;;  %s161_s25 = sand.u32 1, %s2760_s13   ;;  %s2097_s26 = sshll.u32 %s2815_s16, 4 }
  0x19   : > { %2588 = vmatprep.subr.bf16.mxu1 %v2770_v1  ;;  %2440 = vmatprep.mubr.msk.bf16.mxu1 %vm2771_vm0, %v2770_v1  ;;  %s2593_s4 = smul.u32 200, %s164_s28  ;;  %v2674_v37 = vld [vmem:[%s3537_s1 + $0x128] sm:$0xff]   ;;  %v2672_v38 = vld [vmem:[%s3537_s1 + $0x70] sm:$0xff]   ;;  %v2675_v41 = vld [vmem:[%s3537_s1 + $0x78] sm:$0xff]   ;;  %s162_s27 = scalar_lea.vmem [#allocation4], %s161_s25 }
  0x1a   : > { %v2673_v39 = vld [vmem:[%s3537_s1 + $0x30] sm:$0xff]   ;;  %v2676_v42 = vld [vmem:[%s3537_s1 + $0x38] sm:$0xff]   ;;  %v2678_v44 = vld [vmem:[%s3537_s1 + $0x80] sm:$0xff]   ;;  %s1944_s28 = sshll.u32 %s162_s27, 4  ;;  %s1932_s5 = scalar_lea.sflag [#allocation5], %s161_s25  ;;  %s3496_s28 = int_to_ptr.vmem [resolvable:$true] %s1944_s28 }
  0x1b   : > { %2357 = vmatpush3.bf16.msra.mxu0 %v2637_v2  ;;  %s2867_s7 = scalar_lea.vmem %s3536_s0, %s2593_s4  ;;  %v2677_v40 = vld [vmem:[%s3537_s1 + $0x130] sm:$0xff]   ;;  %v2680_v43 = vld [vmem:[%s3537_s1 + $0x138] sm:$0xff]   ;;  %v2679_v45 = vld [vmem:[%s3537_s1 + $0x40] sm:$0xff]   ;;  %s3494_s4 = scalar_lea.hbm %s3539_s3, %s2097_s26 }
  0x1c   : > { %2358 = vmatprep.subr.bf16.mxu0 %v2770_v1  ;;  %2591 = vmatpush3.bf16.msra.mxu1 %v2637_v2  ;;  %v2639_v4 = vld [vmem:[%s2867_s7] sm:$0xff]   ;;  %v2640_v5 = vld [vmem:[%s2867_s7 + $0x8] sm:$0xff]   ;;  %v2641_v8 = vld [vmem:[%s2867_s7 + $0x10] sm:$0xff]   ;;  %s2706_s6 = scalar_lea.vmem %s3496_s28, 16  ;;  %s2773_s16 = smov [#allocation4]  }
  0x1d   : > { %2589 = vmatprep.subr.bf16.mxu1 %v2770_v1  ;;  %v2647_v6 = vld [vmem:[%s2867_s7 + $0xa0] sm:$0xff]   ;;  %v2649_v7 = vld [vmem:[%s2867_s7 + $0xa8] sm:$0xff]   ;;  %v2651_v9 = vld [vmem:[%s2867_s7 + $0xb0] sm:$0xff]   ;;  %p2707_p11 = scmp.ne.s32.totalorder %s3496_s28, %s2706_s6 }
  0x1e   : > { %v2642_v10 = vld [vmem:[%s2867_s7 + $0x18] sm:$0xff]   ;;  %v2643_v12 = vld [vmem:[%s2867_s7 + $0x20] sm:$0xff]   ;;  %v2644_v14 = vld [vmem:[%s2867_s7 + $0x28] sm:$0xff]  }
  0x1f   : > { %2359 = vmatpush3.bf16.msra.mxu0 %v2638_v3  ;;  %v2653_v11 = vld [vmem:[%s2867_s7 + $0xb8] sm:$0xff]   ;;  %v2655_v13 = vld [vmem:[%s2867_s7 + $0xc0] sm:$0xff]   ;;  %v2645_v15 = vld [vmem:[%s2867_s7 + $0x30] sm:$0xff]   ;;  %p2708_p12 = pnand %p2707_p11, %p2832_p5 }
  0x20   : > { %2592 = vmatpush3.bf16.msra.mxu1 %v2638_v3  ;;  %2460 = vmatprep.subr.bf16.mxu0 %v2770_v1  ;;  %v2646_v16 = vld [vmem:[%s2867_s7 + $0x38] sm:$0xff]   ;;  %v2648_v17 = vld [vmem:[%s2867_s7 + $0x40] sm:$0xff]   ;;  %v2650_v18 = vld [vmem:[%s2867_s7 + $0x48] sm:$0xff]  }
  0x21   : > { %v2652_v19 = vld [vmem:[%s2867_s7 + $0x50] sm:$0xff]   ;;  %v2654_v20 = vld [vmem:[%s2867_s7 + $0x58] sm:$0xff]   ;;  %v2656_v21 = vld [vmem:[%s2867_s7 + $0x60] sm:$0xff]   ;;  %2128 = vmatprep.subr.bf16.mxu1 %v2665_v30  ;;  %p2709_p13 = pneg %p2708_p12 }
  0x22   : > { %2361 = vmatmul.mubr.msk.bf16.vlgmr.msra.gmra.mrb[0].mxu0 %vm467_vm1, %v2639_v4  ;;  %v2657_v22 = vld [vmem:[%s2867_s7 + $0x68] sm:$0xff]   ;;  %v2658_v23 = vld [vmem:[%s2867_s7 + $0x70] sm:$0xff]   ;;  %v2659_v24 = vld [vmem:[%s2867_s7 + $0x78] sm:$0xff]  }
  0x23   : > { %2364 = vmatprep.mubr.msk.bf16.mxu0 %vm2771_vm0, %v2770_v1  ;;  %2441 = vmatmul.mubr.msk.bf16.vlgmr.msra.gmra.mrb[0].mxu1 %vm467_vm1, %v2647_v6  ;;  %v2660_v25 = vld [vmem:[%s2867_s7 + $0x80] sm:$0xff]   ;;  %v2661_v26 = vld [vmem:[%s2867_s7 + $0x88] sm:$0xff]   ;;  %v2662_v27 = vld [vmem:[%s2867_s7 + $0x90] sm:$0xff]  }
  0x24   : > { %2444 = vmatprep.mubr.msk.bf16.mxu1 %vm2771_vm0, %v2770_v1  ;;  %v2663_v28 = vld [vmem:[%s2867_s7 + $0x98] sm:$0xff]   ;;  %2461 = vmatpush3.bf16.msra.mxu0 %v2664_v29  ;;  %v2683_v46 = vld [vmem:[%s3537_s1 + $0x140] sm:$0xff]   ;;  %v2681_v47 = vld [vmem:[%s3537_s1 + $0x88] sm:$0xff]   ;;  %s2710_s7 = sshll.u32 %s2773_s16, 4  ;;  %s2711_s7 = int_to_ptr.vmem [resolvable:$false] %s2710_s7 }
  0x25   : > { %2462 = vmatprep.subr.bf16.mxu0 %v2770_v1  ;;  %2129 = vmatpush3.bf16.msra.mxu1 %v2666_v31  ;;  %v2682_v48 = vld [vmem:[%s3537_s1 + $0x48] sm:$0xff]   ;;  %v2684_v50 = vld [vmem:[%s3537_s1 + $0x90] sm:$0xff]   ;;  %v2688_v53 = vld [vmem:[%s3537_s1 + $0xd8] sm:$0xff]   ;;  %s2712_s8 = scalar_lea.vmem %s2711_s7, 32  ;;  %p2713_p0 = scmp.lt.s32.totalorder %s3496_s28, %s2711_s7 }
  0x26   : > { %2130 = vmatprep.subr.bf16.mxu1 %v2667_v32  ;;  %v2685_v49 = vld [vmem:[%s3537_s1 + $0x148] sm:$0xff]   ;;  %v2686_v51 = vld [vmem:[%s3537_s1 + $0x50] sm:$0xff]   ;;  %p2714_p1 = scmp.lt.s32.totalorder %s2712_s8, %s2706_s6 }
  0x27   : > { %v2687_v52 = vld [vmem:[%s3537_s1 + $0x150] sm:$0xff]  }
  0x28   : > { %2463 = vmatpush3.bf16.msra.mxu0 %v2670_v34  ;;  %p2715_p2 = por %p2714_p1, %p2713_p0 }
  0x29   : > { %2131 = vmatpush3.bf16.msra.mxu1 %v2668_v33  ;;  %2464 = vmatprep.subr.bf16.mxu0 %v2770_v1 }
  0x2a   : > { %2365 = vmatmul.mubr.msk.bf16.gmra.mrb[4].mxu0 %vm467_vm1, %v2640_v5  ;;  %2132 = vmatprep.subr.bf16.mxu1 %v2669_v35  ;;  %v801_v35 = vlaneseq  ;;  %p2716_p3 = pnand %p2715_p2, %p2709_p13 }
  0x2b   : > { %2368 = vmatprep.mubr.msk.bf16.mxu0 %vm2771_vm0, %v2770_v1  ;;  %2445 = vmatmul.mubr.msk.bf16.gmra.mrb[4].mxu1 %vm467_vm1, %v2649_v7 }
  0x2c   : > { %2448 = vmatprep.mubr.msk.bf16.mxu1 %vm2771_vm0, %v2770_v1  ;;  %2465 = vmatpush3.bf16.msra.mxu0 %v2674_v37 }
  0x2d   : > { %2133 = vmatpush3.bf16.msra.mxu1 %v2671_v36  ;;  %2466 = vmatprep.subr.bf16.mxu0 %v2770_v1 }
  0x2e   : > { %2134 = vmatprep.subr.bf16.mxu1 %v2672_v38  ;;  %v3089_v38 = vshrl.u32 %v801_v35, 7 }
  0x30   : > { %2467 = vmatpush3.bf16.msra.mxu0 %v2677_v40 }
  0x31   : > { %2135 = vmatpush3.bf16.msra.mxu1 %v2673_v39  ;;  %2468 = vmatprep.subr.bf16.mxu0 %v2770_v1 }
  0x32   : > { %2369 = vmatmul.mubr.msk.bf16.gmra.mrb[8].mxu0 %vm467_vm1, %v2641_v8  ;;  %2136 = vmatprep.subr.bf16.mxu1 %v2675_v41  ;;  %v803_v41 = vsub.s32 0, %v3089_v38 }
  0x33   : > { %2372 = vmatprep.mubr.msk.bf16.mxu0 %vm2771_vm0, %v2770_v1  ;;  %2449 = vmatmul.mubr.msk.bf16.gmra.mrb[8].mxu1 %vm467_vm1, %v2651_v9 }
  0x34   : > { %2452 = vmatprep.mubr.msk.bf16.mxu1 %vm2771_vm0, %v2770_v1  ;;  %2469 = vmatpush3.bf16.msra.mxu0 %v2680_v43 }
  0x35   : > { %2137 = vmatpush3.bf16.msra.mxu1 %v2676_v42  ;;  %2470 = vmatprep.subr.bf16.mxu0 %v2770_v1  ;;  %v185_v42 = vld [vmem:[%s3538_s2 + $0x80] sm:$0xff] }
  0x36   : > { %2138 = vmatprep.subr.bf16.mxu1 %v2678_v44 }
  0x38   : > { %2471 = vmatpush3.bf16.msra.mxu0 %v2683_v46 }
  0x39   : > { %2139 = vmatpush3.bf16.msra.mxu1 %v2679_v45  ;;  %2472 = vmatprep.subr.bf16.mxu0 %v2770_v1  ;;  %v3099_v45 = vrot.slane %v185_v42, %v803_v41 }
  0x3a   : > { %2373 = vmatmul.mubr.msk.bf16.gmra.mrb[12].mxu0 %vm467_vm1, %v2642_v10  ;;  %2140 = vmatprep.subr.bf16.mxu1 %v2681_v47 }
  0x3b   : > { %2376 = vmatprep.mubr.msk.bf16.mxu0 %vm2771_vm0, %v2770_v1  ;;  %2453 = vmatmul.mubr.msk.bf16.gmra.mrb[12].mxu1 %vm467_vm1, %v2653_v11 }
  0x3c   : > { %2456 = vmatprep.mubr.msk.bf16.mxu1 %vm2771_vm0, %v2770_v1  ;;  %2473 = vmatpush3.bf16.msra.mxu0 %v2685_v49 }
  0x3d   : > { %2141 = vmatpush3.bf16.msra.mxu1 %v2682_v48  ;;  %2474 = vmatprep.subr.bf16.mxu0 %v2770_v1 }
  0x3e   : > { %2142 = vmatprep.subr.bf16.mxu1 %v2684_v50 }
  0x40   : > { %2475 = vmatpush3.bf16.msra.mxu0 %v2687_v52 }
  0x41   : > { %2143 = vmatpush3.bf16.msra.mxu1 %v2686_v51 }
  0x42   : > { %2377 = vmatmul.mubr.msk.bf16.gmra.mrb[16].mxu0 %vm467_vm1, %v2643_v12  ;;  %2222 = vmatprep.subr.bf16.mxu1 %v2688_v53 }
  0x43   : > { %2380 = vmatprep.mubr.msk.bf16.mxu0 %vm2771_vm0, %v2770_v1  ;;  %2457 = vmatmul.mubr.msk.bf16.gmra.mrb[16].mxu1 %vm467_vm1, %v2655_v13 }
  0x4a   : > { %2381 = vmatmul.mubr.msk.bf16.gmra.mrb[20].mxu0 %vm467_vm1, %v2644_v14 }
  0x4b   : > { %2384 = vmatprep.mubr.msk.bf16.mxu0 %vm2771_vm0, %v2770_v1 }
  0x52   : > { %2385 = vmatmul.mubr.msk.bf16.gmra.mrb[24].mxu0 %vm467_vm1, %v2645_v15 }
  0x53   : > { %2388 = vmatprep.mubr.msk.bf16.mxu0 %vm2771_vm0, %v2770_v1 }
  0x5a   : > { %2389 = vmatmul.mubr.msk.bf16.gmra.mrb[28].mxu0 %vm467_vm1, %v2646_v16 }
  0x5b   : > { %2392 = vmatprep.mubr.msk.bf16.mxu0 %vm2771_vm0, %v2770_v1 }
  0x62   : > { %2393 = vmatmul.mubr.msk.bf16.gmra.mrb[32].mxu0 %vm467_vm1, %v2648_v17 }
  0x63   : > { %2396 = vmatprep.mubr.msk.bf16.mxu0 %vm2771_vm0, %v2770_v1 }
  0x6a   : > { %2397 = vmatmul.mubr.msk.bf16.gmra.mrb[36].mxu0 %vm467_vm1, %v2650_v18 }
  0x6b   : > { %2400 = vmatprep.mubr.msk.bf16.mxu0 %vm2771_vm0, %v2770_v1 }
  0x72   : > { %2401 = vmatmul.mubr.msk.bf16.gmra.mrb[40].mxu0 %vm467_vm1, %v2652_v19 }
  0x73   : > { %2404 = vmatprep.mubr.msk.bf16.mxu0 %vm2771_vm0, %v2770_v1 }
  0x7a   : > { %2405 = vmatmul.mubr.msk.bf16.gmra.mrb[44].mxu0 %vm467_vm1, %v2654_v20 }
  0x7b   : > { %2408 = vmatprep.mubr.msk.bf16.mxu0 %vm2771_vm0, %v2770_v1 }
  0x82   : > { %2409 = vmatmul.mubr.msk.bf16.gmra.mrb[48].mxu0 %vm467_vm1, %v2656_v21 }
  0x83   : > { %2412 = vmatprep.mubr.msk.bf16.mxu0 %vm2771_vm0, %v2770_v1 }
  0x8a   : > { %2413 = vmatmul.mubr.msk.bf16.gmra.mrb[52].mxu0 %vm467_vm1, %v2657_v22 }
  0x8b   : > { %2416 = vmatprep.mubr.msk.bf16.mxu0 %vm2771_vm0, %v2770_v1 }
  0x92   : > { %2417 = vmatmul.mubr.msk.bf16.gmra.mrb[56].mxu0 %vm467_vm1, %v2658_v23 }
  0x93   : > { %2420 = vmatprep.mubr.msk.bf16.mxu0 %vm2771_vm0, %v2770_v1 }
  0x9a   : > { %2421 = vmatmul.mubr.msk.bf16.gmra.mrb[60].mxu0 %vm467_vm1, %v2659_v24 }
  0x9b   : > { %2424 = vmatprep.mubr.msk.bf16.mxu0 %vm2771_vm0, %v2770_v1 }
  0xa2   : > { %2425 = vmatmul.mubr.msk.bf16.gmra.mrb[64].mxu0 %vm467_vm1, %v2660_v25 }
  0xa3   : > { %2428 = vmatprep.mubr.msk.bf16.mxu0 %vm2771_vm0, %v2770_v1 }
  0xaa   : > { %2429 = vmatmul.mubr.msk.bf16.gmra.mrb[68].mxu0 %vm467_vm1, %v2661_v26 }
  0xab   : > { %2432 = vmatprep.mubr.msk.bf16.mxu0 %vm2771_vm0, %v2770_v1 }
  0xb2   : > { %2433 = vmatmul.mubr.msk.bf16.gmra.mrb[72].mxu0 %vm467_vm1, %v2662_v27 }
  0xb3   : > { %2436 = vmatprep.mubr.msk.bf16.mxu0 %vm2771_vm0, %v2770_v1 }
  0xba   : > { %2437 = vmatmul.mubr.msk.bf16.gmra.mrb[76].mxu0 %vm467_vm1, %v2663_v28 }
  0xbb   : > { %2476 = vmatprep.mubr.msk.bf16.mxu0 %vm2771_vm0, %v2770_v1 }
  0xf5   : > { %v3051_v54 = vpop.f32.mrb[0].mxu0 }
  0xf6   : > { %v2362_v55 = vpop.f32.mrb[1].mxu0  ;;  %v737_v58 = vpop.f32.mrb[0].mxu1 }
  0xf7   : > { %v3053_v56 = vpop.f32.mrb[2].mxu0  ;;  %v2442_v59 = vpop.f32.mrb[1].mxu1 }
  0xf8   : > { %v2363_v57 = vpop.f32.mrb[3].mxu0  ;;  %v740_v61 = vpop.f32.mrb[2].mxu1 }
  0xf9   : > { %v2443_v63 = vpop.f32.mrb[3].mxu1 }
  0xfd   : > { %v3055_v60 = vpop.f32.mrb[4].mxu0 }
  0xfe   : > { %v2366_v62 = vpop.f32.mrb[5].mxu0  ;;  %v745_v3 = vpop.f32.mrb[4].mxu1 }
  0xff   : > { %v3057_v0 = vpop.f32.mrb[6].mxu0  ;;  %v2446_v4 = vpop.f32.mrb[5].mxu1 }
 0x100   : > { %v2367_v2 = vpop.f32.mrb[7].mxu0  ;;  %v3061_v6 = vpop.f32.mrb[6].mxu1 }
 0x101   : > { %v2447_v8 = vpop.f32.mrb[7].mxu1 }
 0x105   : > { %v3059_v5 = vpop.f32.mrb[8].mxu0 }
 0x106   : > { %v2370_v7 = vpop.f32.mrb[9].mxu0  ;;  %v753_v11 = vpop.f32.mrb[8].mxu1 }
 0x107   : > { %v3063_v9 = vpop.f32.mrb[10].mxu0  ;;  %v2450_v12 = vpop.f32.mrb[9].mxu1 }
 0x108   : > { %v2371_v10 = vpop.f32.mrb[11].mxu0  ;;  %v3067_v14 = vpop.f32.mrb[10].mxu1 }
 0x109   : > { %v2451_v16 = vpop.f32.mrb[11].mxu1 }
 0x10d   : > { %v3065_v13 = vpop.f32.mrb[12].mxu0 }
 0x10e   : > { %v2374_v15 = vpop.f32.mrb[13].mxu0  ;;  %v3071_v19 = vpop.f32.mrb[12].mxu1 }
 0x10f   : > { %v3069_v17 = vpop.f32.mrb[14].mxu0  ;;  %v2454_v20 = vpop.f32.mrb[13].mxu1 }
 0x110   : > { %v2375_v18 = vpop.f32.mrb[15].mxu0  ;;  %v3075_v22 = vpop.f32.mrb[14].mxu1 }
 0x111   : > { %v2455_v24 = vpop.f32.mrb[15].mxu1 }
 0x115   : > { %v3073_v21 = vpop.f32.mrb[16].mxu0 }
 0x116   : > { %v2378_v23 = vpop.f32.mrb[17].mxu0  ;;  %v3079_v27 = vpop.f32.mrb[16].mxu1 }
 0x117   : > { %v3077_v25 = vpop.f32.mrb[18].mxu0  ;;  %v2458_v28 = vpop.f32.mrb[17].mxu1 }
 0x118   : > { %v2379_v26 = vpop.f32.mrb[19].mxu0  ;;  %v3083_v30 = vpop.f32.mrb[18].mxu1 }
 0x119   : > { %v2459_v32 = vpop.f32.mrb[19].mxu1 }
 0x11d   : > { %v3081_v29 = vpop.f32.mrb[20].mxu0 }
 0x11e   : > { %v2382_v31 = vpop.f32.mrb[21].mxu0 }
 0x11f   : > { %v3085_v33 = vpop.f32.mrb[22].mxu0 }
 0x120   : > { %v2383_v34 = vpop.f32.mrb[23].mxu0 }
 0x125   : > { %v3087_v36 = vpop.f32.mrb[24].mxu0 }
 0x126   : > { %v2386_v37 = vpop.f32.mrb[25].mxu0 }
 0x127   : > { %v3091_v39 = vpop.f32.mrb[26].mxu0 }
 0x128   : > { %v2387_v40 = vpop.f32.mrb[27].mxu0 }
 0x12d   : > { %v3097_v43 = vpop.f32.mrb[28].mxu0 }
 0x12e   : > { %v2390_v44 = vpop.f32.mrb[29].mxu0 }
 0x12f   : > { %v636_v46 = vpop.f32.mrb[30].mxu0 }
 0x130   : > { %v791_v47 = vmax.f32 %v636_v46, %v737_v58  ;;  %v2391_v48 = vpop.f32.mrb[31].mxu0 }
 0x132   : > { %v820_v49 = vadd.f32 %v3099_v45, %v791_v47 }
 0x134   : > { %v845_v50 = vmax.f32 %v820_v49, 0.0 }
 0x135   : > { %v641_v51 = vpop.f32.mrb[32].mxu0 }
 0x136   : > { %870 = vst [vmem:[#allocation2 + $0x80] sm:$0xff] %v845_v50  ;;  %v792_v52 = vmax.f32 %v641_v51, %v740_v61  ;;  %v2394_v53 = vpop.f32.mrb[33].mxu0 }
 0x137   : > { %v644_v55 = vpop.f32.mrb[34].mxu0 }
 0x138   : > { %v821_v57 = vadd.f32 %v3099_v45, %v792_v52  ;;  %v793_v59 = vmax.f32 %v644_v55, %v745_v3  ;;  %v2395_v62 = vpop.f32.mrb[35].mxu0 }
 0x13a   : > { %v846_v63 = vmax.f32 %v821_v57, 0.0  ;;  %v822_v2 = vadd.f32 %v3099_v45, %v793_v59 }
 0x13c   : > { %871 = vst [vmem:[#allocation2 + $0x88] sm:$0xff] %v846_v63  ;;  %v847_v4 = vmax.f32 %v822_v2, 0.0 }
 0x13d   : > { %v649_v7 = vpop.f32.mrb[36].mxu0 }
 0x13e   : > { %872 = vst [vmem:[#allocation2 + $0x90] sm:$0xff] %v847_v4  ;;  %v794_v58 = vmax.f32 %v649_v7, %v3061_v6  ;;  %v2398_v8 = vpop.f32.mrb[37].mxu0 }
 0x13f   : > { %v652_v10 = vpop.f32.mrb[38].mxu0 }
 0x140   : > { %v823_v12 = vadd.f32 %v3099_v45, %v794_v58  ;;  %v795_v61 = vmax.f32 %v652_v10, %v753_v11  ;;  %v2399_v15 = vpop.f32.mrb[39].mxu0 }
 0x142   : > { %v848_v16 = vmax.f32 %v823_v12, 0.0  ;;  %v824_v18 = vadd.f32 %v3099_v45, %v795_v61 }
 0x144   : > { %873 = vst [vmem:[#allocation2 + $0x98] sm:$0xff] %v848_v16  ;;  %v849_v3 = vmax.f32 %v824_v18, 0.0 }
 0x145   : > { %v657_v20 = vpop.f32.mrb[40].mxu0 }
 0x146   : > { %874 = vst [vmem:[#allocation2 + $0xa0] sm:$0xff] %v849_v3  ;;  %v796_v23 = vmax.f32 %v657_v20, %v3067_v14  ;;  %v2402_v24 = vpop.f32.mrb[41].mxu0 }
 0x147   : > { %v660_v26 = vpop.f32.mrb[42].mxu0 }
 0x148   : > { %v825_v28 = vadd.f32 %v3099_v45, %v796_v23  ;;  %v797_v6 = vmax.f32 %v660_v26, %v3071_v19  ;;  %v2403_v31 = vpop.f32.mrb[43].mxu0 }
 0x14a   : > { %v850_v32 = vmax.f32 %v825_v28, 0.0  ;;  %v826_v11 = vadd.f32 %v3099_v45, %v797_v6 }
 0x14c   : > { %875 = vst [vmem:[#allocation2 + $0xa8] sm:$0xff] %v850_v32  ;;  %v851_v34 = vmax.f32 %v826_v11, 0.0 }
 0x14d   : > { %v665_v35 = vpop.f32.mrb[44].mxu0 }
 0x14e   : > { %876 = vst [vmem:[#allocation2 + $0xb0] sm:$0xff] %v851_v34  ;;  %v798_v37 = vmax.f32 %v665_v35, %v3075_v22  ;;  %v2406_v40 = vpop.f32.mrb[45].mxu0 }
 0x14f   : > { %v668_v41 = vpop.f32.mrb[46].mxu0 }
 0x150   : > { %v827_v14 = vadd.f32 %v3099_v45, %v798_v37  ;;  %v799_v42 = vmax.f32 %v668_v41, %v3079_v27  ;;  %v2407_v44 = vpop.f32.mrb[47].mxu0  ;;  %v2690_v37 = vld [vmem:[%s3537_s1 + $0xe0] sm:$0xff]  }
 0x152   : > { %v852_v46 = vmax.f32 %v827_v14, 0.0  ;;  %v3115_v19 = vadd.f32 %v3099_v45, %v799_v42 }
 0x154   : > { %877 = vst [vmem:[#allocation2 + $0xb8] sm:$0xff] %v852_v46  ;;  %v853_v47 = vmax.f32 %v3115_v19, 0.0 }
 0x155   : > { %v673_v48 = vpop.f32.mrb[48].mxu0 }
 0x156   : > { %878 = vst [vmem:[#allocation2 + $0xc0] sm:$0xff] %v853_v47  ;;  %v800_v22 = vmax.f32 %v673_v48, %v3083_v30  ;;  %v2410_v49 = vpop.f32.mrb[49].mxu0 }
 0x157   : > { %v676_v50 = vpop.f32.mrb[50].mxu0 }
 0x158   : > { %v829_v51 = vadd.f32 %v3099_v45, %v800_v22  ;;  %v776_v27 = vmax.f32 %v3051_v54, %v676_v50  ;;  %v2411_v52 = vpop.f32.mrb[51].mxu0  ;;  %v2691_v22 = vld [vmem:[%s3537_s1 + $0xa0] sm:$0xff]  }
 0x15a   : > { %v3123_v53 = vmax.f32 %v829_v51, 0.0  ;;  %v805_v55 = vadd.f32 %v3099_v45, %v776_v27 }
 0x15c   : > { %879 = vst [vmem:[#allocation2 + $0xc8] sm:$0xff] %v3123_v53  ;;  %v830_v57 = vmax.f32 %v805_v55, 0.0 }
 0x15d   : > { %v681_v59 = vpop.f32.mrb[52].mxu0 }
 0x15e   : > { %855 = vst [vmem:[#allocation2 + $0x8] sm:$0xff] %v830_v57  ;;  %v777_v62 = vmax.f32 %v3053_v56, %v681_v59  ;;  %v2414_v63 = vpop.f32.mrb[53].mxu0 }
 0x15f   : > { %v684_v30 = vpop.f32.mrb[54].mxu0 }
 0x160   : > { %v806_v2 = vadd.f32 %v3099_v45, %v777_v62  ;;  %v778_v4 = vmax.f32 %v3055_v60, %v684_v30  ;;  %v2415_v7 = vpop.f32.mrb[55].mxu0  ;;  %v2693_v62 = vld [vmem:[%s3537_s1 + $0xa8] sm:$0xff]  }
 0x161   : > { %v2694_v7 = vld [vmem:[%s3537_s1 + $0xf0] sm:$0xff]  }
 0x162   : > { %v831_v54 = vmax.f32 %v806_v2, 0.0  ;;  %v807_v58 = vadd.f32 %v3099_v45, %v778_v4 }
 0x164   : > { %856 = vst [vmem:[#allocation2 + $0x10] sm:$0xff] %v831_v54  ;;  %v832_v8 = vmax.f32 %v807_v58, 0.0  ;;  %v3131_v12 = vpack.c.bf16 %v831_v54, %v830_v57 }
 0x165   : > { %v689_v10 = vpop.f32.mrb[56].mxu0  ;;  %v905_v23 = vld [vmem:[#allocation2 + $0x7] sm:$0xff] }
 0x166   : > { %857 = vst [vmem:[#allocation2 + $0x18] sm:$0xff] %v832_v8  ;;  %v779_v61 = vmax.f32 %v3057_v0, %v689_v10  ;;  %v2418_v15 = vpop.f32.mrb[57].mxu0  ;;  %v880_v26 = vld [vmem:[#allocation2 + $0x6] sm:$0xff]  ;;  %v2689_v0 = vld [vmem:[%s3537_s1 + $0x98] sm:$0xff]  }
 0x167   : > { %v692_v56 = vpop.f32.mrb[58].mxu0 }
 0x168   : > { %v808_v16 = vadd.f32 %v3099_v45, %v779_v61  ;;  %v780_v18 = vmax.f32 %v3059_v5, %v692_v56  ;;  %v2419_v3 = vpop.f32.mrb[59].mxu0 }
 0x16a   : > { %v833_v60 = vmax.f32 %v808_v16, 0.0  ;;  %v809_v20 = vadd.f32 %v3099_v45, %v780_v18  ;;  %v2695_v16 = vld [vmem:[%s3537_s1 + $0xb0] sm:$0xff]  }
 0x16b   : > { %v906_v24 = vld [vmem:[#allocation2 + $0xf] sm:$0xff] }
 0x16c   : > { %v881_v28 = vld [vmem:[#allocation2 + $0xe] sm:$0xff]  ;;  %858 = vst [vmem:[#allocation2 + $0x20] sm:$0xff] %v833_v60  ;;  %v834_v6 = vmax.f32 %v809_v20, 0.0  ;;  %v1006_v31 = vpack.c.bf16 %v906_v24, %v905_v23  ;;  %v3140_v11 = vpack.c.bf16 %v833_v60, %v832_v8 }
 0x16d   : > { %v1005_v32 = vpack.c.bf16 %v881_v28, %v880_v26  ;;  %v697_v34 = vpop.f32.mrb[60].mxu0  ;;  %v980_v5 = vld [vmem:[#allocation2 + $0xa] sm:$0xff]  ;;  %v981_v35 = vld [vmem:[#allocation2 + $0x12] sm:$0xff] }
 0x16e   : > { %859 = vst [vmem:[#allocation2 + $0x28] sm:$0xff] %v834_v6  ;;  %v781_v40 = vmax.f32 %v3063_v9, %v697_v34  ;;  %v2422_v41 = vpop.f32.mrb[61].mxu0  ;;  %1342 = vmatprep.mubr.bf16.mxu1 %v1006_v31  ;;  %v1009_v14 = vpack.c.bf16 %v981_v35, %v980_v5  ;;  %v2692_v9 = vld [vmem:[%s3537_s1 + $0xe8] sm:$0xff]   ;;  %v907_v51 = vld [vmem:[#allocation2 + $0x17] sm:$0xff]  ;;  %v2698_v34 = vld [vmem:[%s3537_s1 + $0x100] sm:$0xff]  }
 0x16f   : > { %v700_v42 = vpop.f32.mrb[62].mxu0  ;;  %1343 = vmatmul.mubr.bf16.vlgmr.msra.gmra.mrb[20].mxu1 %v1005_v32  ;;  %v882_v27 = vld [vmem:[#allocation2 + $0x16] sm:$0xff] }
 0x170   : > { %v810_v44 = vadd.f32 %v3099_v45, %v781_v40  ;;  %v782_v46 = vmax.f32 %v3065_v13, %v700_v42  ;;  %2223 = vmatpush3.bf16.msra.mxu1 %v2689_v0  ;;  %v2423_v48 = vpop.f32.mrb[63].mxu0  ;;  %2477 = vmatmul.mubr.bf16.vlgmr.msra.gmra.mrb[80].mxu0 %v1009_v14 }
 0x171   : > { %2480 = vmatprep.mubr.msk.bf16.mxu0 %vm2771_vm0, %v2770_v1  ;;  %2224 = vmatprep.subr.bf16.mxu1 %v2690_v37 }
 0x172   : > { %v835_v49 = vmax.f32 %v810_v44, 0.0  ;;  %v811_v50 = vadd.f32 %v3099_v45, %v782_v46  ;;  %v2699_v44 = vld [vmem:[%s3537_s1 + $0xc0] sm:$0xff]  }
 0x173   : > { %v908_v13 = vld [vmem:[#allocation2 + $0x1f] sm:$0xff] }
 0x174   : > { %v883_v52 = vld [vmem:[#allocation2 + $0x1e] sm:$0xff]  ;;  %860 = vst [vmem:[#allocation2 + $0x30] sm:$0xff] %v835_v49  ;;  %v836_v55 = vmax.f32 %v811_v50, 0.0  ;;  %v1011_v57 = vpack.c.bf16 %v908_v13, %v907_v51  ;;  %2225 = vmatpush3.bf16.msra.mxu1 %v2691_v22  ;;  %v3160_v63 = vpack.c.bf16 %v835_v49, %v834_v6 }
 0x175   : > { %v1010_v59 = vpack.c.bf16 %v883_v52, %v882_v27  ;;  %v705_v30 = vpop.f32.mrb[64].mxu0  ;;  %v982_v2 = vld [vmem:[#allocation2 + $0x1a] sm:$0xff]  ;;  %v983_v4 = vld [vmem:[#allocation2 + $0x22] sm:$0xff]  ;;  %2226 = vmatprep.subr.bf16.mxu1 %v2692_v9 }
 0x176   : > { %861 = vst [vmem:[#allocation2 + $0x38] sm:$0xff] %v836_v55  ;;  %v783_v54 = vmax.f32 %v3069_v17, %v705_v30  ;;  %v2426_v58 = vpop.f32.mrb[65].mxu0  ;;  %1350 = vmatprep.mubr.bf16.mxu1 %v1011_v57  ;;  %v1014_v8 = vpack.c.bf16 %v983_v4, %v982_v2  ;;  %v2696_v17 = vld [vmem:[%s3537_s1 + $0xf8] sm:$0xff]   ;;  %v909_v60 = vld [vmem:[#allocation2 + $0x27] sm:$0xff]  ;;  %v2702_v30 = vld [vmem:[%s3537_s1 + $0x110] sm:$0xff]  }
 0x177   : > { %v708_v10 = vpop.f32.mrb[66].mxu0  ;;  %1351 = vmatmul.mubr.bf16.gmra.mrb[24].mxu1 %v1010_v59  ;;  %v884_v20 = vld [vmem:[#allocation2 + $0x26] sm:$0xff] }
 0x178   : > { %v812_v61 = vadd.f32 %v3099_v45, %v783_v54  ;;  %v784_v15 = vmax.f32 %v3073_v21, %v708_v10  ;;  %v2427_v56 = vpop.f32.mrb[67].mxu0  ;;  %2481 = vmatmul.mubr.bf16.gmra.mrb[84].mxu0 %v1014_v8  ;;  %2227 = vmatpush3.bf16.msra.mxu1 %v2693_v62  ;;  %v3191_v46 = vld [vmem:[#allocation2] sm:$0xff]  ;;  %v2701_v52 = vld [vmem:[%s3537_s1 + $0xc8] sm:$0xff]  }
 0x179   : > { %2484 = vmatprep.mubr.msk.bf16.mxu0 %vm2771_vm0, %v2770_v1  ;;  %2228 = vmatprep.subr.bf16.mxu1 %v2694_v7  ;;  %v2697_v1 = vld [vmem:[%s3537_s1 + $0xb8] sm:$0xff]  }
 0x17a   : > { %v837_v18 = vmax.f32 %v812_v61, 0.0  ;;  %v813_v3 = vadd.f32 %v3099_v45, %v784_v15  ;;  %v2703_v61 = vld [vmem:[%s3537_s1 + $0xd0] sm:$0xff]  }
 0x17b   : > { %v910_v21 = vld [vmem:[#allocation2 + $0x2f] sm:$0xff] }
 0x17c   : > { %v885_v23 = vld [vmem:[#allocation2 + $0x2e] sm:$0xff]  ;;  %862 = vst [vmem:[#allocation2 + $0x40] sm:$0xff] %v837_v18  ;;  %v838_v24 = vmax.f32 %v813_v3, 0.0  ;;  %v1016_v26 = vpack.c.bf16 %v910_v21, %v909_v60  ;;  %2229 = vmatpush3.bf16.msra.mxu1 %v2695_v16  ;;  %v3180_v6 = vpack.c.bf16 %v837_v18, %v836_v55 }
 0x17d   : > { %v1015_v28 = vpack.c.bf16 %v885_v23, %v884_v20  ;;  %v713_v31 = vpop.f32.mrb[68].mxu0  ;;  %v984_v32 = vld [vmem:[#allocation2 + $0x2a] sm:$0xff]  ;;  %v985_v0 = vld [vmem:[#allocation2 + $0x32] sm:$0xff]  ;;  %2230 = vmatprep.subr.bf16.mxu1 %v2696_v17 }
 0x17e   : > { %863 = vst [vmem:[#allocation2 + $0x48] sm:$0xff] %v838_v24  ;;  %v785_v5 = vmax.f32 %v3077_v25, %v713_v31  ;;  %v2430_v35 = vpop.f32.mrb[69].mxu0  ;;  %1358 = vmatprep.mubr.bf16.mxu1 %v1016_v26  ;;  %v1019_v37 = vpack.c.bf16 %v985_v0, %v984_v32  ;;  %v2700_v25 = vld [vmem:[%s3537_s1 + $0x108] sm:$0xff]   ;;  %v911_v22 = vld [vmem:[#allocation2 + $0x37] sm:$0xff] }
 0x17f   : > { %v716_v40 = vpop.f32.mrb[70].mxu0  ;;  %1359 = vmatmul.mubr.bf16.gmra.mrb[28].mxu1 %v1015_v28  ;;  %v886_v49 = vld [vmem:[#allocation2 + $0x36] sm:$0xff] }
 0x180   : > { %v814_v41 = vadd.f32 %v3099_v45, %v785_v5  ;;  %v786_v14 = vmax.f32 %v3081_v29, %v716_v40  ;;  %v2431_v42 = vpop.f32.mrb[71].mxu0  ;;  %2485 = vmatmul.mubr.bf16.gmra.mrb[88].mxu0 %v1019_v37  ;;  %2231 = vmatpush3.bf16.msra.mxu1 %v2697_v1 }
 0x181   : > { %2488 = vmatprep.mubr.msk.bf16.mxu0 %vm2771_vm0, %v3191_v46  ;;  %2232 = vmatprep.subr.bf16.mxu1 %v2698_v34 }
 0x182   : > { %v839_v48 = vmax.f32 %v814_v41, 0.0  ;;  %v815_v29 = vadd.f32 %v3099_v45, %v786_v14 }
 0x183   : > { %v912_v9 = vld [vmem:[#allocation2 + $0x3f] sm:$0xff] }
 0x184   : > { %v887_v50 = vld [vmem:[#allocation2 + $0x3e] sm:$0xff]  ;;  %864 = vst [vmem:[#allocation2 + $0x50] sm:$0xff] %v839_v48  ;;  %v840_v51 = vmax.f32 %v815_v29, 0.0  ;;  %v1021_v13 = vpack.c.bf16 %v912_v9, %v911_v22  ;;  %2233 = vmatpush3.bf16.msra.mxu1 %v2699_v44  ;;  %v3202_v55 = vpack.c.bf16 %v839_v48, %v838_v24 }
 0x185   : > { %v1020_v27 = vpack.c.bf16 %v887_v50, %v886_v49  ;;  %v721_v57 = vpop.f32.mrb[72].mxu0  ;;  %v986_v59 = vld [vmem:[#allocation2 + $0x3a] sm:$0xff]  ;;  %v987_v62 = vld [vmem:[#allocation2 + $0x42] sm:$0xff]  ;;  %2234 = vmatprep.subr.bf16.mxu1 %v2700_v25 }
 0x186   : > { %865 = vst [vmem:[#allocation2 + $0x58] sm:$0xff] %v840_v51  ;;  %v787_v2 = vmax.f32 %v3085_v33, %v721_v57  ;;  %v2434_v4 = vpop.f32.mrb[73].mxu0  ;;  %1366 = vmatprep.mubr.bf16.mxu1 %v1021_v13  ;;  %v1024_v7 = vpack.c.bf16 %v987_v62, %v986_v59  ;;  %v913_v56 = vld [vmem:[#allocation2 + $0x47] sm:$0xff] }
 0x187   : > { %v724_v54 = vpop.f32.mrb[74].mxu0  ;;  %1367 = vmatmul.mubr.bf16.gmra.mrb[32].mxu1 %v1020_v27  ;;  %v888_v17 = vld [vmem:[#allocation2 + $0x46] sm:$0xff]  ;;  %v922_v4 = vld [vmem:[#allocation2 + $0x8f] sm:$0xff] }
 0x188   : > { %v816_v58 = vadd.f32 %v3099_v45, %v787_v2  ;;  %v788_v8 = vmax.f32 %v3087_v36, %v724_v54  ;;  %v2435_v10 = vpop.f32.mrb[75].mxu0  ;;  %2489 = vmatmul.mubr.bf16.gmra.mrb[92].mxu0 %v1024_v7  ;;  %2235 = vmatpush3.bf16.msra.mxu1 %v2701_v52 }
 0x189   : > { %2492 = vmatprep.mubr.msk.bf16.mxu0 %vm2771_vm0, %v3191_v46  ;;  %2236 = vmatprep.subr.bf16.mxu1 %v2702_v30 }
 0x18a   : > { %v841_v33 = vmax.f32 %v816_v58, 0.0  ;;  %v817_v15 = vadd.f32 %v3099_v45, %v788_v8  ;;  %v921_v58 = vld [vmem:[#allocation2 + $0x87] sm:$0xff] }
 0x18b   : > { %v914_v16 = vld [vmem:[#allocation2 + $0x4f] sm:$0xff]  ;;  %v995_v8 = vld [vmem:[#allocation2 + $0x82] sm:$0xff]  ;;  %v1046_v10 = vpack.c.bf16 %v922_v4, %v921_v58  ;;  %v957_v4 = vld [vmem:[#allocation2 + $0x19] sm:$0xff] }
 0x18c   : > { %v889_v18 = vld [vmem:[#allocation2 + $0x4e] sm:$0xff]  ;;  %866 = vst [vmem:[#allocation2 + $0x60] sm:$0xff] %v841_v33  ;;  %v842_v36 = vmax.f32 %v817_v15, 0.0  ;;  %v1026_v3 = vpack.c.bf16 %v914_v16, %v913_v56  ;;  %2237 = vmatpush3.bf16.msra.mxu1 %v2703_v61  ;;  %v3216_v21 = vpack.c.bf16 %v841_v33, %v840_v51  ;;  %v924_v15 = vld [vmem:[#allocation2 + $0x9f] sm:$0xff] }
 0x18d   : > { %v1025_v60 = vpack.c.bf16 %v889_v18, %v888_v17  ;;  %v729_v20 = vpop.f32.mrb[76].mxu0  ;;  %v988_v23 = vld [vmem:[#allocation2 + $0x4a] sm:$0xff]  ;;  %v989_v24 = vld [vmem:[#allocation2 + $0x52] sm:$0xff] }
 0x18e   : > { %867 = vst [vmem:[#allocation2 + $0x68] sm:$0xff] %v842_v36  ;;  %v789_v26 = vmax.f32 %v3091_v39, %v729_v20  ;;  %v2438_v28 = vpop.f32.mrb[77].mxu0  ;;  %1374 = vmatprep.mubr.bf16.mxu1 %v1026_v3  ;;  %v1029_v1 = vpack.c.bf16 %v989_v24, %v988_v23  ;;  %v915_v37 = vld [vmem:[#allocation2 + $0x57] sm:$0xff]  ;;  %v897_v33 = vld [vmem:[#allocation2 + $0x8e] sm:$0xff]  ;;  %v896_v16 = vld [vmem:[#allocation2 + $0x86] sm:$0xff] }
 0x18f   : > { %v732_v31 = vpop.f32.mrb[78].mxu0  ;;  %1375 = vmatmul.mubr.bf16.gmra.mrb[36].mxu1 %v1025_v60  ;;  %v890_v40 = vld [vmem:[#allocation2 + $0x56] sm:$0xff]  ;;  %v1045_v17 = vpack.c.bf16 %v897_v33, %v896_v16  ;;  %v899_v20 = vld [vmem:[#allocation2 + $0x9e] sm:$0xff]  ;;  %v959_v58 = vld [vmem:[#allocation2 + $0x29] sm:$0xff] }
 0x190   : > { %v818_v32 = vadd.f32 %v3099_v45, %v789_v26  ;;  %v790_v0 = vmax.f32 %v3097_v43, %v732_v31  ;;  %v2439_v34 = vpop.f32.mrb[79].mxu0  ;;  %2493 = vmatmul.mubr.bf16.gmra.mrb[96].mxu0 %v1029_v1  ;;  %v997_v56 = vld [vmem:[#allocation2 + $0x92] sm:$0xff]  ;;  %v999_v24 = vld [vmem:[#allocation2 + $0xa2] sm:$0xff]  ;;  %v998_v31 = vld [vmem:[#allocation2 + $0x9a] sm:$0xff] }
 0x191   : > { %2496 = vmatprep.mubr.msk.bf16.mxu0 %vm2771_vm0, %v3191_v46  ;;  %v923_v18 = vld [vmem:[#allocation2 + $0x97] sm:$0xff]  ;;  %v926_v23 = vld [vmem:[#allocation2 + $0xaf] sm:$0xff]  ;;  %v925_v1 = vld [vmem:[#allocation2 + $0xa7] sm:$0xff] }
 0x192   : > { %v843_v5 = vmax.f32 %v818_v32, 0.0  ;;  %v3224_v35 = vadd.f32 %v3099_v45, %v790_v0  ;;  %v1051_v3 = vpack.c.bf16 %v924_v15, %v923_v18  ;;  %v898_v26 = vld [vmem:[#allocation2 + $0x96] sm:$0xff]  ;;  %v1056_v32 = vpack.c.bf16 %v926_v23, %v925_v1  ;;  %v901_v34 = vld [vmem:[#allocation2 + $0xae] sm:$0xff]  ;;  %v945_v23 = vld [vmem:[#allocation2 + $0x80] sm:$0xff] }
 0x193   : > { %v916_v39 = vld [vmem:[#allocation2 + $0x5f] sm:$0xff]  ;;  %v1050_v28 = vpack.c.bf16 %v899_v20, %v898_v26  ;;  %v1054_v0 = vpack.c.bf16 %v999_v24, %v998_v31  ;;  %v964_v15 = vld [vmem:[#allocation2 + $0x51] sm:$0xff]  ;;  %v971_v26 = vld [vmem:[#allocation2 + $0x89] sm:$0xff] }
 0x194   : > { %v891_v41 = vld [vmem:[#allocation2 + $0x5e] sm:$0xff]  ;;  %868 = vst [vmem:[#allocation2 + $0x70] sm:$0xff] %v843_v5  ;;  %v844_v14 = vmax.f32 %v3224_v35, 0.0  ;;  %v1031_v42 = vpack.c.bf16 %v916_v39, %v915_v37  ;;  %v3227_v25 = vpack.c.bf16 %v843_v5, %v842_v36  ;;  %v996_v36 = vld [vmem:[#allocation2 + $0x8a] sm:$0xff]  ;;  %v1001_v37 = vld [vmem:[#allocation2 + $0xb2] sm:$0xff] }
 0x195   : > { %v1030_v44 = vpack.c.bf16 %v891_v41, %v890_v40  ;;  %v990_v43 = vld [vmem:[#allocation2 + $0x5a] sm:$0xff]  ;;  %v991_v48 = vld [vmem:[#allocation2 + $0x62] sm:$0xff]  ;;  %v1049_v60 = vpack.c.bf16 %v997_v56, %v996_v36  ;;  %v951_v35 = vld [vmem:[#allocation2 + $0xb0] sm:$0xff] }
 0x196   : > { %869 = vst [vmem:[#allocation2 + $0x78] sm:$0xff] %v844_v14  ;;  %1382 = vmatprep.mubr.bf16.mxu1 %v1031_v42  ;;  %v1034_v29 = vpack.c.bf16 %v991_v48, %v990_v43  ;;  %v917_v45 = vld [vmem:[#allocation2 + $0x67] sm:$0xff]  ;;  %v928_v5 = vld [vmem:[#allocation2 + $0xbf] sm:$0xff]  ;;  %v927_v41 = vld [vmem:[#allocation2 + $0xb7] sm:$0xff]  ;;  %v1042_v24 = vpack.c.bf16 %v945_v23, %v844_v14 }
 0x197   : > { %1383 = vmatmul.mubr.bf16.gmra.mrb[40].mxu1 %v1030_v44  ;;  %v892_v9 = vld [vmem:[#allocation2 + $0x66] sm:$0xff]  ;;  %v1061_v44 = vpack.c.bf16 %v928_v5, %v927_v41  ;;  %v903_v48 = vld [vmem:[#allocation2 + $0xbe] sm:$0xff] }
 0x198   : > { %2497 = vmatmul.mubr.bf16.gmra.mrb[100].mxu0 %v1034_v29  ;;  %v900_v39 = vld [vmem:[#allocation2 + $0xa6] sm:$0xff]  ;;  %v948_v5 = vld [vmem:[#allocation2 + $0x98] sm:$0xff] }
 0x199   : > { %2500 = vmatprep.mubr.msk.bf16.mxu0 %vm2771_vm0, %v3191_v46  ;;  %v1055_v40 = vpack.c.bf16 %v901_v34, %v900_v39  ;;  %v1000_v42 = vld [vmem:[#allocation2 + $0xaa] sm:$0xff]  ;;  %v974_v1 = vld [vmem:[#allocation2 + $0xa1] sm:$0xff] }
 0x19a   : > { %v1059_v43 = vpack.c.bf16 %v1001_v37, %v1000_v42  ;;  %v929_v29 = vld [vmem:[#allocation2 + $0xc7] sm:$0xff] }
 0x19b   : > { %v918_v22 = vld [vmem:[#allocation2 + $0x6f] sm:$0xff]  ;;  %v949_v34 = vld [vmem:[#allocation2 + $0xa0] sm:$0xff] }
 0x19c   : > { %v893_v49 = vld [vmem:[#allocation2 + $0x6e] sm:$0xff]  ;;  %v1036_v50 = vpack.c.bf16 %v918_v22, %v917_v45  ;;  %v1003_v45 = vld [vmem:[#allocation2 + $0xc2] sm:$0xff]  ;;  %v902_v22 = vld [vmem:[#allocation2 + $0xb6] sm:$0xff]  ;;  %v1052_v37 = vpack.c.bf16 %v949_v34, %v948_v5 }
 0x19d   : > { %v1035_v51 = vpack.c.bf16 %v893_v49, %v892_v9  ;;  %v992_v13 = vld [vmem:[#allocation2 + $0x6a] sm:$0xff]  ;;  %v919_v27 = vld [vmem:[#allocation2 + $0x77] sm:$0xff]  ;;  %v920_v52 = vld [vmem:[#allocation2 + $0x7f] sm:$0xff]  ;;  %v1060_v9 = vpack.c.bf16 %v903_v48, %v902_v22 }
 0x19e   : > { %v993_v57 = vld [vmem:[#allocation2 + $0x72] sm:$0xff]  ;;  %1390 = vmatprep.mubr.bf16.mxu1 %v1036_v50  ;;  %v1041_v59 = vpack.c.bf16 %v920_v52, %v919_v27  ;;  %v895_v2 = vld [vmem:[#allocation2 + $0x7e] sm:$0xff]  ;;  %v1066_v50 = vpack.c.bf16 %v929_v29, %v929_v29  ;;  %v1004_v52 = vld [vmem:[#allocation2 + $0xca] sm:$0xff] }
 0x19f   : > { %v1039_v62 = vpack.c.bf16 %v993_v57, %v992_v13  ;;  %1391 = vmatmul.mubr.bf16.gmra.mrb[44].mxu1 %v1035_v51  ;;  %v894_v30 = vld [vmem:[#allocation2 + $0x76] sm:$0xff]  ;;  %v904_v13 = vld [vmem:[#allocation2 + $0xc6] sm:$0xff] }
 0x1a0   : > { %1398 = vmatprep.mubr.bf16.mxu1 %v1041_v59  ;;  %v994_v7 = vld [vmem:[#allocation2 + $0x7a] sm:$0xff]  ;;  %v1040_v54 = vpack.c.bf16 %v895_v2, %v894_v30  ;;  %v956_v27 = vld [vmem:[#allocation2 + $0x11] sm:$0xff]  ;;  %v1065_v57 = vpack.c.bf16 %v904_v13, %v904_v13  ;;  %v955_v59 = vld [vmem:[#allocation2 + $0x9] sm:$0xff]  ;;  %v1069_v30 = vpack.c.bf16 %v1004_v52, %v1004_v52 }
 0x1a1   : > { %2501 = vmatmul.mubr.bf16.gmra.mrb[104].mxu0 %v1039_v62  ;;  %v1044_v61 = vpack.c.bf16 %v995_v8, %v994_v7  ;;  %v1002_v49 = vld [vmem:[#allocation2 + $0xba] sm:$0xff]  ;;  %v1008_v62 = vpack.c.bf16 %v956_v27, %v955_v59  ;;  %v963_v56 = vld [vmem:[#allocation2 + $0x49] sm:$0xff] }
 0x1a2   : > { %2504 = vmatprep.mubr.msk.bf16.mxu0 %vm2771_vm0, %v3191_v46  ;;  %v1064_v51 = vpack.c.bf16 %v1003_v45, %v1002_v49  ;;  %v958_v2 = vld [vmem:[#allocation2 + $0x21] sm:$0xff]  ;;  %v1028_v16 = vpack.c.bf16 %v964_v15, %v963_v56  ;;  %v967_v36 = vld [vmem:[#allocation2 + $0x69] sm:$0xff]  ;;  %v952_v48 = vld [vmem:[#allocation2 + $0xb8] sm:$0xff] }
 0x1a3   : > { %v1013_v7 = vpack.c.bf16 %v958_v2, %v957_v4  ;;  %v946_v31 = vld [vmem:[#allocation2 + $0x88] sm:$0xff]  ;;  %v1062_v45 = vpack.c.bf16 %v853_v47, %v952_v48 }
 0x1a4   : > { %v975_v39 = vld [vmem:[#allocation2 + $0xa9] sm:$0xff]  ;;  %v978_v14 = vld [vmem:[#allocation2 + $0xc1] sm:$0xff] }
 0x1a5   : > { %v950_v41 = vld [vmem:[#allocation2 + $0xa8] sm:$0xff] }
 0x1a6   : > { %v1057_v42 = vpack.c.bf16 %v951_v35, %v950_v41  ;;  %v979_v29 = vld [vmem:[#allocation2 + $0xc9] sm:$0xff] }
 0x1a7   : > { %1399 = vmatmul.mubr.bf16.gmra.mrb[48].mxu1 %v1040_v54  ;;  %v960_v54 = vld [vmem:[#allocation2 + $0x31] sm:$0xff]  ;;  %v1068_v22 = vpack.c.bf16 %v979_v29, %v979_v29  ;;  %v174_v41 = vld [vmem:[%s3538_s2 + $0x28] sm:$0xff] }
 0x1a8   : > { %1406 = vmatprep.mubr.bf16.mxu1 %v1046_v10  ;;  %v1018_v8 = vpack.c.bf16 %v960_v54, %v959_v58  ;;  %v962_v10 = vld [vmem:[#allocation2 + $0x41] sm:$0xff] }
 0x1a9   : > { %2505 = vmatmul.mubr.bf16.gmra.mrb[108].mxu0 %v1044_v61  ;;  %v961_v61 = vld [vmem:[#allocation2 + $0x39] sm:$0xff] }
 0x1aa   : > { %2508 = vmatprep.mubr.msk.bf16.mxu0 %vm2771_vm0, %v3191_v46  ;;  %v1023_v33 = vpack.c.bf16 %v962_v10, %v961_v61 }
 0x1af   : > { %1407 = vmatmul.mubr.bf16.gmra.mrb[52].mxu1 %v1045_v17  ;;  %v965_v17 = vld [vmem:[#allocation2 + $0x59] sm:$0xff] }
 0x1b0   : > { %1414 = vmatprep.mubr.bf16.mxu1 %v1051_v3 }
 0x1b1   : > { %2509 = vmatmul.mubr.bf16.gmra.mrb[112].mxu0 %v1049_v60  ;;  %v970_v60 = vld [vmem:[#allocation2 + $0x81] sm:$0xff] }
 0x1b2   : > { %2512 = vmatprep.mubr.msk.bf16.mxu0 %vm2771_vm0, %v3191_v46 }
 0x1b7   : > { %1415 = vmatmul.mubr.bf16.gmra.mrb[56].mxu1 %v1050_v28  ;;  %v947_v28 = vld [vmem:[#allocation2 + $0x90] sm:$0xff] }
 0x1b8   : > { %1422 = vmatprep.mubr.bf16.mxu1 %v1056_v32  ;;  %v973_v32 = vld [vmem:[#allocation2 + $0x99] sm:$0xff] }
 0x1b9   : > { %2513 = vmatmul.mubr.bf16.gmra.mrb[116].mxu0 %v1054_v0  ;;  %v1053_v0 = vpack.c.bf16 %v974_v1, %v973_v32  ;;  %v172_v1 = vld [vmem:[%s3538_s2 + $0x18] sm:$0xff] }
 0x1ba   : > { %2516 = vmatprep.mubr.msk.bf16.mxu0 %vm2771_vm0, %v3191_v46 }
 0x1bf   : > { %1423 = vmatmul.mubr.bf16.gmra.mrb[60].mxu1 %v1055_v40 }
 0x1c0   : > { %1430 = vmatprep.mubr.bf16.mxu1 %v1061_v44  ;;  %v977_v44 = vld [vmem:[#allocation2 + $0xb9] sm:$0xff] }
 0x1c1   : > { %2517 = vmatmul.mubr.bf16.gmra.mrb[120].mxu0 %v1059_v43  ;;  %v1063_v43 = vpack.c.bf16 %v978_v14, %v977_v44  ;;  %v173_v14 = vld [vmem:[%s3538_s2 + $0x20] sm:$0xff] }
 0x1c2   : > { %2520 = vmatprep.mubr.msk.bf16.mxu0 %vm2771_vm0, %v3191_v46 }
 0x1c7   : > { %1431 = vmatmul.mubr.bf16.gmra.mrb[64].mxu1 %v1060_v9  ;;  %v1067_v9 = vpack.c.bf16 %v3123_v53, %v3123_v53 }
 0x1c8   : > { %1438 = vmatprep.mubr.bf16.mxu1 %v1066_v50 }
 0x1c9   : > { %2521 = vmatmul.mubr.bf16.gmra.mrb[124].mxu0 %v1064_v51 }
 0x1ca   : > { %2524 = vmatprep.mubr.msk.bf16.mxu0 %vm2771_vm0, %v3191_v46 }
 0x1cf   : > { %1439 = vmatmul.mubr.bf16.gmra.mrb[68].mxu1 %v1065_v57 }
 0x1d0   : > { %1478 = vmatprep.mubr.bf16.mxu1 %v1008_v62 }
 0x1d1   : > { %2525 = vmatmul.mubr.bf16.gmra.mrb[128].mxu0 %v1069_v30 }
 0x1d7   : > { %1479 = vmatmul.mubr.bf16.vlgmr.msra.gmra.mrb[72].mxu1 %v3131_v12  ;;  %v966_v12 = vld [vmem:[#allocation2 + $0x61] sm:$0xff] }
 0x1d8   : > { %1486 = vmatprep.mubr.bf16.mxu1 %v1013_v7  ;;  %v1033_v18 = vpack.c.bf16 %v966_v12, %v965_v17  ;;  %v169_v12 = vld [vmem:[%s3538_s2] sm:$0xff]  ;;  %v170_v17 = vld [vmem:[%s3538_s2 + $0x8] sm:$0xff] }
 0x1df   : > { %1487 = vmatmul.mubr.bf16.gmra.mrb[76].mxu1 %v3140_v11  ;;  %v968_v11 = vld [vmem:[#allocation2 + $0x71] sm:$0xff] }
 0x1e0   : > { %1494 = vmatprep.mubr.bf16.mxu1 %v1018_v8  ;;  %v1038_v3 = vpack.c.bf16 %v968_v11, %v967_v36  ;;  %v2772_v36 = vmov 0.0|0.0  }
 0x1e1   : > { %2563 = vmatprep.subr.bf16.mxu1 %v2772_v36 }
 0x1e7   : > { %1495 = vmatmul.mubr.bf16.gmra.mrb[80].mxu1 %v3160_v63  ;;  %v969_v63 = vld [vmem:[#allocation2 + $0x79] sm:$0xff] }
 0x1e8   : > { %1502 = vmatprep.mubr.bf16.mxu1 %v1023_v33  ;;  %v1043_v20 = vpack.c.bf16 %v970_v60, %v969_v63 }
 0x1ef   : > { %1503 = vmatmul.mubr.bf16.gmra.mrb[84].mxu1 %v3180_v6  ;;  %v972_v6 = vld [vmem:[#allocation2 + $0x91] sm:$0xff] }
 0x1f0   : > { %1510 = vmatprep.mubr.bf16.mxu1 %v1028_v16 }
 0x1f7   : > { %1511 = vmatmul.mubr.bf16.gmra.mrb[88].mxu1 %v3202_v55  ;;  %v1048_v55 = vpack.c.bf16 %v972_v6, %v971_v26 }
 0x1f8   : > { %1518 = vmatprep.mubr.bf16.mxu1 %v1033_v18 }
 0x1ff   : > { %1519 = vmatmul.mubr.bf16.gmra.mrb[92].mxu1 %v3216_v21  ;;  %v1047_v21 = vpack.c.bf16 %v947_v28, %v946_v31  ;;  %v171_v28 = vld [vmem:[%s3538_s2 + $0x10] sm:$0xff] }
 0x200   : > { %1526 = vmatprep.mubr.bf16.mxu1 %v1038_v3  ;;  %v2564_v3 = vpack.c.bf16 %v170_v17, %v169_v12  ;;  %v2567_v32 = vpack.c.bf16 %v172_v1, %v171_v28 }
 0x202   : > { %2565 = vmatpush3.bf16.msra.mxu1 %v2564_v3 }
 0x203   : > { %2566 = vmatprep.subr.bf16.mxu1 %v2772_v36 }
 0x206   : > { %2568 = vmatpush3.bf16.msra.mxu1 %v2567_v32 }
 0x207   : > { %1527 = vmatmul.mubr.bf16.gmra.mrb[96].mxu1 %v3227_v25  ;;  %v976_v25 = vld [vmem:[#allocation2 + $0xb1] sm:$0xff]  ;;  %2569 = vmatprep.subr.bf16.mxu1 %v2772_v36 }
 0x208   : > { %1534 = vmatprep.mubr.bf16.mxu1 %v1043_v20  ;;  %v1058_v40 = vpack.c.bf16 %v976_v25, %v975_v39 }
 0x20f   : > { %1535 = vmatmul.mubr.bf16.gmra.mrb[100].mxu1 %v1042_v24 }
 0x210   : > { %1542 = vmatprep.mubr.bf16.mxu1 %v1048_v55 }
 0x217   : > { %1543 = vmatmul.mubr.bf16.gmra.mrb[104].mxu1 %v1047_v21 }
 0x218   : > { %1550 = vmatprep.mubr.bf16.mxu1 %v1053_v0 }
 0x21f   : > { %1551 = vmatmul.mubr.bf16.gmra.mrb[108].mxu1 %v1052_v37 }
 0x220   : > { %1558 = vmatprep.mubr.bf16.mxu1 %v1058_v40 }
 0x227   : > { %1559 = vmatmul.mubr.bf16.gmra.mrb[112].mxu1 %v1057_v42 }
 0x228   : > { %1566 = vmatprep.mubr.bf16.mxu1 %v1063_v43  ;;  %v2570_v43 = vpack.c.bf16 %v174_v41, %v173_v14 }
 0x22a   : > { %2571 = vmatpush3.bf16.msra.mxu1 %v2570_v43 }
 0x22b   : > { %2572 = vmatprep.subr.bf16.mxu1 %v2772_v36 }
 0x22f   : > { %1567 = vmatmul.mubr.bf16.gmra.mrb[116].mxu1 %v1062_v45 }
 0x230   : > { %1574 = vmatprep.mubr.bf16.mxu1 %v1068_v22 }
 0x237   : > { %1575 = vmatmul.mubr.bf16.gmra.mrb[120].mxu1 %v1067_v9 }
 0x238   : > { %2560 = vmatprep.mubr.msk.f32.mxu1 %vm2771_vm0, %v3191_v46 }
 0x242   : > { %v2144_v49 = vpop.f32.mrb[20].mxu1 }
 0x243   : > { %v2145_v50 = vpop.f32.mrb[21].mxu1  ;;  %v3260_v51 = vpop.f32.mrb[80].mxu0 }
 0x244   : > { %v3262_v13 = vadd.f32 %v2145_v50, %v2144_v49  ;;  %v2147_v27 = vpop.f32.mrb[22].mxu1  ;;  %v2478_v52 = vpop.f32.mrb[81].mxu0 }
 0x245   : > { %v2148_v19 = vpop.f32.mrb[23].mxu1  ;;  %v3264_v47 = vpop.f32.mrb[82].mxu0 }
 0x246   : > { %v3266_v57 = vadd.f32 %v2148_v19, %v2147_v27  ;;  %v2479_v59 = vpop.f32.mrb[83].mxu0 }
 0x24a   : > { %v2150_v62 = vpop.f32.mrb[24].mxu1 }
 0x24b   : > { %v2151_v53 = vpop.f32.mrb[25].mxu1  ;;  %v3268_v30 = vpop.f32.mrb[84].mxu0 }
 0x24c   : > { %v3270_v2 = vadd.f32 %v2151_v53, %v2150_v62  ;;  %v2153_v46 = vpop.f32.mrb[26].mxu1  ;;  %v2482_v4 = vpop.f32.mrb[85].mxu0 }
 0x24d   : > { %v2154_v7 = vpop.f32.mrb[27].mxu1  ;;  %v3272_v54 = vpop.f32.mrb[86].mxu0 }
 0x24e   : > { %v3274_v58 = vadd.f32 %v2154_v7, %v2153_v46  ;;  %v2483_v8 = vpop.f32.mrb[87].mxu0 }
 0x252   : > { %v2156_v10 = vpop.f32.mrb[28].mxu1 }
 0x253   : > { %v2157_v61 = vpop.f32.mrb[29].mxu1  ;;  %v3276_v33 = vpop.f32.mrb[88].mxu0 }
 0x254   : > { %v3278_v15 = vadd.f32 %v2157_v61, %v2156_v10  ;;  %v2159_v56 = vpop.f32.mrb[30].mxu1  ;;  %v2486_v16 = vpop.f32.mrb[89].mxu0  ;;  %v175_v61 = vld [vmem:[%s3538_s2 + $0x30] sm:$0xff] }
 0x255   : > { %v2160_v18 = vpop.f32.mrb[31].mxu1  ;;  %v3286_v11 = vpop.f32.mrb[90].mxu0 }
 0x256   : > { %v3289_v63 = vadd.f32 %v2160_v18, %v2159_v56  ;;  %v2487_v60 = vpop.f32.mrb[91].mxu0  ;;  %v176_v56 = vld [vmem:[%s3538_s2 + $0x38] sm:$0xff] }
 0x257   : > { %v2573_v17 = vpack.c.bf16 %v176_v56, %v175_v61  ;;  %v179_v61 = vld [vmem:[%s3538_s2 + $0x50] sm:$0xff]  ;;  %v180_v56 = vld [vmem:[%s3538_s2 + $0x58] sm:$0xff] }
 0x259   : > { %2574 = vmatpush3.bf16.msra.mxu1 %v2573_v17 }
 0x25a   : > { %v2162_v20 = vpop.f32.mrb[32].mxu1  ;;  %2575 = vmatprep.subr.bf16.mxu1 %v2772_v36 }
 0x25b   : > { %v2163_v6 = vpop.f32.mrb[33].mxu1  ;;  %v3292_v23 = vpop.f32.mrb[92].mxu0 }
 0x25c   : > { %v3294_v24 = vadd.f32 %v2163_v6, %v2162_v20  ;;  %v2165_v26 = vpop.f32.mrb[34].mxu1  ;;  %v2490_v55 = vpop.f32.mrb[93].mxu0 }
 0x25d   : > { %v2166_v31 = vpop.f32.mrb[35].mxu1  ;;  %v3302_v21 = vpop.f32.mrb[94].mxu0 }
 0x25e   : > { %v3304_v0 = vadd.f32 %v2166_v31, %v2165_v26  ;;  %v2491_v34 = vpop.f32.mrb[95].mxu0 }
 0x262   : > { %v2168_v25 = vpop.f32.mrb[36].mxu1 }
 0x263   : > { %v2169_v5 = vpop.f32.mrb[37].mxu1  ;;  %v3307_v37 = vpop.f32.mrb[96].mxu0 }
 0x264   : > { %v3309_v39 = vadd.f32 %v2169_v5, %v2168_v25  ;;  %v2171_v40 = vpop.f32.mrb[38].mxu1  ;;  %v2494_v35 = vpop.f32.mrb[97].mxu0  ;;  %v177_v5 = vld [vmem:[%s3538_s2 + $0x40] sm:$0xff] }
 0x265   : > { %v2172_v42 = vpop.f32.mrb[39].mxu1  ;;  %v3317_v44 = vpop.f32.mrb[98].mxu0 }
 0x266   : > { %v3319_v48 = vadd.f32 %v2172_v42, %v2171_v40  ;;  %v2495_v29 = vpop.f32.mrb[99].mxu0  ;;  %v178_v40 = vld [vmem:[%s3538_s2 + $0x48] sm:$0xff] }
 0x267   : > { %v2576_v41 = vpack.c.bf16 %v178_v40, %v177_v5 }
 0x269   : > { %2577 = vmatpush3.bf16.msra.mxu1 %v2576_v41 }
 0x26a   : > { %v2174_v45 = vpop.f32.mrb[40].mxu1  ;;  %2578 = vmatprep.subr.bf16.mxu1 %v2772_v36 }
 0x26b   : > { %v2175_v22 = vpop.f32.mrb[41].mxu1  ;;  %v3322_v9 = vpop.f32.mrb[100].mxu0 }
 0x26c   : > { %v3324_v49 = vadd.f32 %v2175_v22, %v2174_v45  ;;  %v2177_v50 = vpop.f32.mrb[42].mxu1  ;;  %v2498_v27 = vpop.f32.mrb[101].mxu0 }
 0x26d   : > { %v2178_v52 = vpop.f32.mrb[43].mxu1  ;;  %v3326_v19 = vpop.f32.mrb[102].mxu0 }
 0x26e   : > { %v3328_v59 = vadd.f32 %v2178_v52, %v2177_v50  ;;  %v2499_v62 = vpop.f32.mrb[103].mxu0 }
 0x272   : > { %v2180_v53 = vpop.f32.mrb[44].mxu1 }
 0x273   : > { %v2181_v46 = vpop.f32.mrb[45].mxu1 }
 0x274   : > { %v3330_v4 = vpop.f32.mrb[104].mxu0  ;;  %v3332_v7 = vadd.f32 %v2181_v46, %v2180_v53  ;;  %v2183_v8 = vpop.f32.mrb[46].mxu1 }
 0x275   : > { %v2502_v10 = vpop.f32.mrb[105].mxu0  ;;  %v2184_v16 = vpop.f32.mrb[47].mxu1 }
 0x276   : > { %v3340_v12 = vpop.f32.mrb[106].mxu0  ;;  %v3342_v18 = vadd.f32 %v2184_v16, %v2183_v8 }
 0x277   : > { %v2503_v3 = vpop.f32.mrb[107].mxu0 }
 0x278   : > { %v2579_v3 = vpack.c.bf16 %v180_v56, %v179_v61 }
 0x27a   : > { %v2186_v60 = vpop.f32.mrb[48].mxu1  ;;  %2580 = vmatpush3.bf16.msra.mxu1 %v2579_v3 }
 0x27b   : > { %v2187_v20 = vpop.f32.mrb[49].mxu1  ;;  %2581 = vmatprep.subr.bf16.mxu1 %v2772_v36 }
 0x27c   : > { %v3345_v6 = vpop.f32.mrb[108].mxu0  ;;  %v3347_v26 = vadd.f32 %v2187_v20, %v2186_v60  ;;  %v2189_v55 = vpop.f32.mrb[50].mxu1 }
 0x27d   : > { %v2506_v28 = vpop.f32.mrb[109].mxu0  ;;  %v2190_v1 = vpop.f32.mrb[51].mxu1 }
 0x27e   : > { %v3349_v31 = vpop.f32.mrb[110].mxu0  ;;  %v3351_v32 = vadd.f32 %v2190_v1, %v2189_v55  ;;  %v181_v28 = vld [vmem:[%s3538_s2 + $0x60] sm:$0xff]  ;;  %v182_v1 = vld [vmem:[%s3538_s2 + $0x68] sm:$0xff] }
 0x27f   : > { %v2507_v34 = vpop.f32.mrb[111].mxu0  ;;  %v2582_v40 = vpack.c.bf16 %v182_v1, %v181_v28 }
 0x280   : > { %v183_v34 = vld [vmem:[%s3538_s2 + $0x70] sm:$0xff] }
 0x281   : > { %2583 = vmatpush3.bf16.msra.mxu1 %v2582_v40 }
 0x282   : > { %v2192_v25 = vpop.f32.mrb[52].mxu1  ;;  %2584 = vmatprep.subr.bf16.mxu1 %v2772_v36 }
 0x283   : > { %v2193_v35 = vpop.f32.mrb[53].mxu1 }
 0x284   : > { %v3359_v14 = vpop.f32.mrb[112].mxu0  ;;  %v3361_v42 = vadd.f32 %v2193_v35, %v2192_v25  ;;  %v2195_v43 = vpop.f32.mrb[54].mxu1  ;;  %v184_v35 = vld [vmem:[%s3538_s2 + $0x78] sm:$0xff] }
 0x285   : > { %v2510_v29 = vpop.f32.mrb[113].mxu0  ;;  %v2196_v45 = vpop.f32.mrb[55].mxu1 }
 0x286   : > { %v3363_v22 = vpop.f32.mrb[114].mxu0  ;;  %v3365_v50 = vadd.f32 %v2196_v45, %v2195_v43 }
 0x287   : > { %v2511_v27 = vpop.f32.mrb[115].mxu0 }
 0x28a   : > { %v2198_v52 = vpop.f32.mrb[56].mxu1 }
 0x28b   : > { %v2199_v62 = vpop.f32.mrb[57].mxu1 }
 0x28c   : > { %v3368_v53 = vpop.f32.mrb[116].mxu0  ;;  %v3370_v46 = vadd.f32 %v2199_v62, %v2198_v52  ;;  %v2201_v8 = vpop.f32.mrb[58].mxu1  ;;  %v2585_v52 = vpack.c.bf16 %v184_v35, %v183_v34 }
 0x28d   : > { %v2514_v10 = vpop.f32.mrb[117].mxu0  ;;  %v2202_v16 = vpop.f32.mrb[59].mxu1 }
 0x28e   : > { %v3378_v17 = vpop.f32.mrb[118].mxu0  ;;  %v3380_v60 = vadd.f32 %v2202_v16, %v2201_v8  ;;  %2586 = vmatpush3.bf16.msra.mxu1 %v2585_v52 }
 0x28f   : > { %v2515_v20 = vpop.f32.mrb[119].mxu0 }
 0x292   : > { %v2204_v55 = vpop.f32.mrb[60].mxu1 }
 0x293   : > { %v2205_v25 = vpop.f32.mrb[61].mxu1 }
 0x294   : > { %v3392_v5 = vpop.f32.mrb[120].mxu0  ;;  %v3397_v41 = vadd.f32 %v2205_v25, %v2204_v55  ;;  %v2207_v43 = vpop.f32.mrb[62].mxu1 }
 0x295   : > { %v2518_v29 = vpop.f32.mrb[121].mxu0  ;;  %v2208_v45 = vpop.f32.mrb[63].mxu1 }
 0x296   : > { %v3399_v27 = vpop.f32.mrb[122].mxu0  ;;  %v3401_v62 = vadd.f32 %v2208_v45, %v2207_v43 }
 0x297   : > { %v2519_v8 = vpop.f32.mrb[123].mxu0 }
 0x29a   : > { %v2210_v10 = vpop.f32.mrb[64].mxu1 }
 0x29b   : > { %v2211_v61 = vpop.f32.mrb[65].mxu1 }
 0x29c   : > { %v3404_v56 = vpop.f32.mrb[124].mxu0  ;;  %v3406_v16 = vadd.f32 %v2211_v61, %v2210_v10  ;;  %v2213_v3 = vpop.f32.mrb[66].mxu1 }
 0x29d   : > { %3542 = vst [vmem:[#allocation7_spill] sm:$0xff] %v3404_v56  ;;  %v2522_v20 = vpop.f32.mrb[125].mxu0  ;;  %v2214_v55 = vpop.f32.mrb[67].mxu1 }
 0x29e   : > { %3543 = vst [vmem:[#allocation8_spill] sm:$0xff] %v3406_v16  ;;  %v3408_v28 = vpop.f32.mrb[126].mxu0  ;;  %v3410_v1 = vadd.f32 %v2214_v55, %v2213_v3 }
 0x29f   : > { %3544 = vst [vmem:[#allocation9_spill] sm:$0xff] %v3408_v28  ;;  %v2523_v34 = vpop.f32.mrb[127].mxu0 }
 0x2a2   : > { %v2216_v25 = vpop.f32.mrb[68].mxu1 }
 0x2a3   : > { %v2217_v40 = vpop.f32.mrb[69].mxu1 }
 0x2a4   : > { %v3412_v35 = vpop.f32.mrb[128].mxu0  ;;  %v3414_v36 = vadd.f32 %v2217_v40, %v2216_v25  ;;  %v2219_v43 = vpop.f32.mrb[70].mxu1 }
 0x2a5   : > { %v2526_v29 = vpop.f32.mrb[129].mxu0  ;;  %v2220_v45 = vpop.f32.mrb[71].mxu1 }
 0x2a6   : > { %v1715_v52 = vpop.f32.mrb[130].mxu0 }
 0x2a7   : > { %v2527_v8 = vpop.f32.mrb[131].mxu0 }
 0x2aa   : > { %v2238_v10 = vpop.f32.mrb[72].mxu1 }
 0x2ab   : > { %v2239_v61 = vpop.f32.mrb[73].mxu1 }
 0x2ac   : > { %v2240_v20 = vadd.f32 %v2239_v61, %v2238_v10  ;;  %v2241_v56 = vpop.f32.mrb[74].mxu1 }
 0x2ad   : > { %v2242_v16 = vpop.f32.mrb[75].mxu1 }
 0x2ae   : > { %v1481_v3 = vadd.f32 %v2240_v20, %v3262_v13  ;;  %v2243_v55 = vadd.f32 %v2242_v16, %v2241_v56 }
 0x2b0   : > { %v1617_v34 = vadd.f32 %v3260_v51, %v1481_v3  ;;  %v1484_v28 = vadd.f32 %v2243_v55, %v3266_v57 }
 0x2b2   : > { %1718 = vst [vmem:[#allocation3] sm:$0xff] %v1617_v34  ;;  %v1620_v25 = vadd.f32 %v3264_v47, %v1484_v28  ;;  %v2244_v40 = vpop.f32.mrb[76].mxu1 }
 0x2b3   : > { %v2245_v43 = vpop.f32.mrb[77].mxu1 }
 0x2b4   : > { %1719 = vst [vmem:[#allocation3 + $0x8] sm:$0xff] %v1620_v25  ;;  %v2246_v29 = vadd.f32 %v2245_v43, %v2244_v40  ;;  %v2247_v45 = vpop.f32.mrb[78].mxu1 }
 0x2b5   : > { %v2248_v52 = vpop.f32.mrb[79].mxu1 }
 0x2b6   : > { %v1489_v8 = vadd.f32 %v2246_v29, %v3270_v2  ;;  %v2249_v10 = vadd.f32 %v2248_v52, %v2247_v45 }
 0x2b8   : > { %v1625_v61 = vadd.f32 %v3268_v30, %v1489_v8  ;;  %v1492_v13 = vadd.f32 %v2249_v10, %v3274_v58 }
 0x2ba   : > { %1720 = vst [vmem:[#allocation3 + $0x10] sm:$0xff] %v1625_v61  ;;  %v1628_v51 = vadd.f32 %v3272_v54, %v1492_v13  ;;  %v2250_v57 = vpop.f32.mrb[80].mxu1 }
 0x2bb   : > { %v2251_v56 = vpop.f32.mrb[81].mxu1 }
 0x2bc   : > { %1721 = vst [vmem:[#allocation3 + $0x18] sm:$0xff] %v1628_v51  ;;  %v2252_v47 = vadd.f32 %v2251_v56, %v2250_v57  ;;  %v2253_v16 = vpop.f32.mrb[82].mxu1 }
 0x2bd   : > { %v2254_v28 = vpop.f32.mrb[83].mxu1 }
 0x2be   : > { %v1497_v20 = vadd.f32 %v2252_v47, %v3278_v15  ;;  %v2255_v3 = vadd.f32 %v2254_v28, %v2253_v16 }
 0x2c0   : > { %v1633_v55 = vadd.f32 %v3276_v33, %v1497_v20  ;;  %v1500_v2 = vadd.f32 %v2255_v3, %v3289_v63 }
 0x2c2   : > { %1722 = vst [vmem:[#allocation3 + $0x20] sm:$0xff] %v1633_v55  ;;  %v1636_v30 = vadd.f32 %v3286_v11, %v1500_v2  ;;  %v2256_v58 = vpop.f32.mrb[84].mxu1 }
 0x2c3   : > { %v2257_v34 = vpop.f32.mrb[85].mxu1 }
 0x2c4   : > { %1723 = vst [vmem:[#allocation3 + $0x28] sm:$0xff] %v1636_v30  ;;  %v2258_v54 = vadd.f32 %v2257_v34, %v2256_v58  ;;  %v2259_v25 = vpop.f32.mrb[86].mxu1 }
 0x2c5   : > { %v2260_v40 = vpop.f32.mrb[87].mxu1 }
 0x2c6   : > { %v1505_v43 = vadd.f32 %v2258_v54, %v3294_v24  ;;  %v2261_v29 = vadd.f32 %v2260_v40, %v2259_v25 }
 0x2c8   : > { %v1641_v45 = vadd.f32 %v3292_v23, %v1505_v43  ;;  %v1508_v15 = vadd.f32 %v2261_v29, %v3304_v0 }
 0x2ca   : > { %1724 = vst [vmem:[#allocation3 + $0x30] sm:$0xff] %v1641_v45  ;;  %v1644_v33 = vadd.f32 %v3302_v21, %v1508_v15  ;;  %v2262_v63 = vpop.f32.mrb[88].mxu1 }
 0x2cb   : > { %v2263_v52 = vpop.f32.mrb[89].mxu1 }
 0x2cc   : > { %1725 = vst [vmem:[#allocation3 + $0x38] sm:$0xff] %v1644_v33  ;;  %v2264_v11 = vadd.f32 %v2263_v52, %v2262_v63  ;;  %v2265_v8 = vpop.f32.mrb[90].mxu1 }
 0x2cd   : > { %v2266_v10 = vpop.f32.mrb[91].mxu1 }
 0x2ce   : > { %v1513_v61 = vadd.f32 %v2264_v11, %v3309_v39  ;;  %v2267_v13 = vadd.f32 %v2266_v10, %v2265_v8 }
 0x2d0   : > { %v1649_v51 = vadd.f32 %v3307_v37, %v1513_v61  ;;  %v1516_v24 = vadd.f32 %v2267_v13, %v3319_v48 }
 0x2d2   : > { %1726 = vst [vmem:[#allocation3 + $0x40] sm:$0xff] %v1649_v51  ;;  %v1652_v23 = vadd.f32 %v3317_v44, %v1516_v24  ;;  %v2268_v0 = vpop.f32.mrb[92].mxu1 }
 0x2d3   : > { %v2269_v57 = vpop.f32.mrb[93].mxu1 }
 0x2d4   : > { %1727 = vst [vmem:[#allocation3 + $0x48] sm:$0xff] %v1652_v23  ;;  %v2270_v21 = vadd.f32 %v2269_v57, %v2268_v0  ;;  %v2271_v56 = vpop.f32.mrb[94].mxu1  ;;  %v1745_v57 = vld [vmem:[#allocation3 + $0x10] ss:$2 sm:$0xff] }
 0x2d5   : > { %v2272_v47 = vpop.f32.mrb[95].mxu1 }
 0x2d6   : > { %v1521_v16 = vadd.f32 %v2270_v21, %v3324_v49  ;;  %v2273_v28 = vadd.f32 %v2272_v47, %v2271_v56  ;;  %v1743_v47 = vld [vmem:[#allocation3] ss:$2 sm:$0xff] }
 0x2d8   : > { %v1657_v20 = vadd.f32 %v3322_v9, %v1521_v16  ;;  %v1524_v39 = vadd.f32 %v2273_v28, %v3328_v59  ;;  %v1809_v16 = vsub.s32 1, %v3089_v38 }
 0x2da   : > { %1728 = vst [vmem:[#allocation3 + $0x50] sm:$0xff] %v1657_v20  ;;  %v1660_v37 = vadd.f32 %v3326_v19, %v1524_v39  ;;  %v2274_v48 = vpop.f32.mrb[96].mxu1  ;;  %v1747_v20 = vld [vmem:[#allocation3 + $0x20] ss:$2 sm:$0xff]  ;;  %v1773_v39 = vld [vmem:[#allocation3 + $0x21] ss:$2 sm:$0xff] }
 0x2db   : > { %v2275_v3 = vpop.f32.mrb[97].mxu1 }
 0x2dc   : > { %1729 = vst [vmem:[#allocation3 + $0x58] sm:$0xff] %v1660_v37  ;;  %v2276_v44 = vadd.f32 %v2275_v3, %v2274_v48  ;;  %v2277_v55 = vpop.f32.mrb[98].mxu1  ;;  %v1749_v48 = vld [vmem:[#allocation3 + $0x30] ss:$2 sm:$0xff] }
 0x2dd   : > { %v2278_v2 = vpop.f32.mrb[99].mxu1 }
 0x2de   : > { %v1529_v30 = vadd.f32 %v2276_v44, %v3332_v7  ;;  %v2279_v58 = vadd.f32 %v2278_v2, %v2277_v55  ;;  %v3463_v2 = vld [vmem:[%s3538_s2 + $0x80] sm:$0xff] }
 0x2df   : > { %v3466_v38 = vrot.slane %v3463_v2, %v1809_v16 }
 0x2e0   : > { %v1665_v34 = vadd.f32 %v3330_v4, %v1529_v30  ;;  %v1532_v49 = vadd.f32 %v2279_v58, %v3342_v18  ;;  %v1796_v30 = vmax.f32 %v1747_v20, %v1773_v39  ;;  %v1751_v58 = vld [vmem:[#allocation3 + $0x40] ss:$2 sm:$0xff] }
 0x2e2   : > { %1730 = vst [vmem:[#allocation3 + $0x60] sm:$0xff] %v1665_v34  ;;  %v1668_v9 = vadd.f32 %v3340_v12, %v1532_v49  ;;  %v2280_v59 = vpop.f32.mrb[100].mxu1 }
 0x2e3   : > { %v2281_v54 = vpop.f32.mrb[101].mxu1 }
 0x2e4   : > { %1731 = vst [vmem:[#allocation3 + $0x68] sm:$0xff] %v1668_v9  ;;  %v2282_v19 = vadd.f32 %v2281_v54, %v2280_v59  ;;  %v2283_v25 = vpop.f32.mrb[102].mxu1  ;;  %v1753_v59 = vld [vmem:[#allocation3 + $0x50] ss:$2 sm:$0xff]  ;;  %v1779_v54 = vld [vmem:[#allocation3 + $0x51] ss:$2 sm:$0xff] }
 0x2e5   : > { %v2284_v40 = vpop.f32.mrb[103].mxu1 }
 0x2e6   : > { %v1537_v43 = vadd.f32 %v2282_v19, %v3347_v26  ;;  %v2285_v29 = vadd.f32 %v2284_v40, %v2283_v25 }
 0x2e8   : > { %v1673_v45 = vadd.f32 %v3345_v6, %v1537_v43  ;;  %v1540_v7 = vadd.f32 %v2285_v29, %v3351_v32  ;;  %v1813_v43 = vadd.f32 %v3466_v38, %v1796_v30 }
 0x2ea   : > { %1732 = vst [vmem:[#allocation3 + $0x70] sm:$0xff] %v1673_v45  ;;  %v1676_v4 = vadd.f32 %v3349_v31, %v1540_v7  ;;  %v2286_v18 = vpop.f32.mrb[104].mxu1  ;;  %v3545_v7 = vld [vmem:[#allocation8_spill] sm:$0xff] }
 0x2eb   : > { %v2287_v15 = vpop.f32.mrb[105].mxu1 }
 0x2ec   : > { %1733 = vst [vmem:[#allocation3 + $0x78] sm:$0xff] %v1676_v4  ;;  %v2288_v12 = vadd.f32 %v2287_v15, %v2286_v18  ;;  %v2289_v33 = vpop.f32.mrb[106].mxu1  ;;  %v1781_v15 = vld [vmem:[#allocation3 + $0x61] ss:$2 sm:$0xff] }
 0x2ed   : > { %v2290_v63 = vpop.f32.mrb[107].mxu1 }
 0x2ee   : > { %v1545_v52 = vadd.f32 %v2288_v12, %v3361_v42  ;;  %v2291_v11 = vadd.f32 %v2290_v63, %v2289_v33  ;;  %v1799_v33 = vmax.f32 %v1753_v59, %v1779_v54 }
 0x2f0   : > { %v1681_v8 = vadd.f32 %v3359_v14, %v1545_v52  ;;  %v1548_v26 = vadd.f32 %v2291_v11, %v3365_v50  ;;  %v3546_v52 = vld [vmem:[#allocation7_spill] sm:$0xff] }
 0x2f2   : > { %1734 = vst [vmem:[#allocation3 + $0x80] sm:$0xff] %v1681_v8  ;;  %v1684_v6 = vadd.f32 %v3363_v22, %v1548_v26  ;;  %v2292_v32 = vpop.f32.mrb[108].mxu1  ;;  %v1771_v22 = vld [vmem:[#allocation3 + $0x11] ss:$2 sm:$0xff] }
 0x2f3   : > { %v2293_v10 = vpop.f32.mrb[109].mxu1  ;;  %v1795_v37 = vmax.f32 %v1745_v57, %v1771_v22  ;;  %v1757_v26 = vld [vmem:[#allocation3 + $0x70] ss:$2 sm:$0xff] }
 0x2f4   : > { %1735 = vst [vmem:[#allocation3 + $0x88] sm:$0xff] %v1684_v6  ;;  %v2294_v31 = vadd.f32 %v2293_v10, %v2292_v32  ;;  %v2295_v61 = vpop.f32.mrb[110].mxu1  ;;  %v1783_v6 = vld [vmem:[#allocation3 + $0x71] ss:$2 sm:$0xff] }
 0x2f5   : > { %v2296_v13 = vpop.f32.mrb[111].mxu1 }
 0x2f6   : > { %v1553_v51 = vadd.f32 %v2294_v31, %v3370_v46  ;;  %v2297_v24 = vadd.f32 %v2296_v13, %v2295_v61  ;;  %v1769_v46 = vld [vmem:[#allocation3 + $0x1] ss:$2 sm:$0xff]  ;;  %v1826_v61 = vmax.f32 %v1813_v43, 0.0 }
 0x2f7   : > { %v1794_v55 = vmax.f32 %v1743_v47, %v1769_v46  ;;  %v3547_v13 = vld [vmem:[#allocation9_spill] sm:$0xff] }
 0x2f8   : > { %v1689_v23 = vadd.f32 %v3368_v53, %v1553_v51  ;;  %v1556_v42 = vadd.f32 %v2297_v24, %v3380_v60 }
 0x2f9   : > { %v1811_v40 = vadd.f32 %v3466_v38, %v1794_v55 }
 0x2fa   : > { %1736 = vst [vmem:[#allocation3 + $0x90] sm:$0xff] %v1689_v23  ;;  %v1692_v14 = vadd.f32 %v3378_v17, %v1556_v42  ;;  %v2298_v50 = vpop.f32.mrb[112].mxu1  ;;  %v1775_v17 = vld [vmem:[#allocation3 + $0x31] ss:$2 sm:$0xff] }
 0x2fb   : > { %v2299_v0 = vpop.f32.mrb[113].mxu1  ;;  %v1797_v9 = vmax.f32 %v1749_v48, %v1775_v17  ;;  %v1824_v32 = vmax.f32 %v1811_v40, 0.0  ;;  %v1759_v23 = vld [vmem:[#allocation3 + $0x80] ss:$2 sm:$0xff]  ;;  %v1785_v42 = vld [vmem:[#allocation3 + $0x81] ss:$2 sm:$0xff] }
 0x2fc   : > { %1737 = vst [vmem:[#allocation3 + $0x98] sm:$0xff] %v1692_v14  ;;  %v2300_v21 = vadd.f32 %v2299_v0, %v2298_v50  ;;  %v2301_v56 = vpop.f32.mrb[114].mxu1  ;;  %v1801_v50 = vmax.f32 %v1757_v26, %v1783_v6  ;;  %v1816_v0 = vadd.f32 %v3466_v38, %v1799_v33  ;;  %v1802_v20 = vmax.f32 %v1759_v23, %v1785_v42 }
 0x2fd   : > { %v2302_v28 = vpop.f32.mrb[115].mxu1  ;;  %v1814_v63 = vadd.f32 %v3466_v38, %v1797_v9 }
 0x2fe   : > { %v1561_v53 = vadd.f32 %v2300_v21, %v3397_v41  ;;  %v2303_v60 = vadd.f32 %v2302_v28, %v2301_v56  ;;  %v1777_v41 = vld [vmem:[#allocation3 + $0x41] ss:$2 sm:$0xff]  ;;  %v1818_v17 = vadd.f32 %v3466_v38, %v1801_v50 }
 0x2ff   : > { %v1798_v29 = vmax.f32 %v1751_v58, %v1777_v41  ;;  %v1827_v57 = vmax.f32 %v1814_v63, 0.0  ;;  %v1819_v58 = vadd.f32 %v3466_v38, %v1802_v20 }
 0x300   : > { %v1697_v3 = vadd.f32 %v3392_v5, %v1561_v53  ;;  %v1564_v44 = vadd.f32 %v2303_v60, %v3401_v62  ;;  %v1812_v5 = vadd.f32 %v3466_v38, %v1795_v37 }
 0x301   : > { %v1815_v31 = vadd.f32 %v3466_v38, %v1798_v29 }
 0x302   : > { %1738 = vst [vmem:[#allocation3 + $0xa0] sm:$0xff] %v1697_v3  ;;  %v1700_v34 = vadd.f32 %v3399_v27, %v1564_v44  ;;  %v2304_v49 = vpop.f32.mrb[116].mxu1  ;;  %v1755_v27 = vld [vmem:[#allocation3 + $0x60] ss:$2 sm:$0xff]  ;;  %v1825_v12 = vmax.f32 %v1812_v5, 0.0  ;;  %v1829_v3 = vmax.f32 %v1816_v0, 0.0 }
 0x303   : > { %v2305_v62 = vpop.f32.mrb[117].mxu1  ;;  %v1800_v10 = vmax.f32 %v1755_v27, %v1781_v15  ;;  %v1761_v56 = vld [vmem:[#allocation3 + $0x90] ss:$2 sm:$0xff]  ;;  %v1787_v47 = vld [vmem:[#allocation3 + $0x91] ss:$2 sm:$0xff]  ;;  %v1828_v53 = vmax.f32 %v1815_v31, 0.0 }
 0x304   : > { %1739 = vst [vmem:[#allocation3 + $0xa8] sm:$0xff] %v1700_v34  ;;  %v2306_v19 = vadd.f32 %v2305_v62, %v2304_v49  ;;  %v2307_v25 = vpop.f32.mrb[118].mxu1  ;;  %v1837_v22 = vadd.f32 %v1825_v12, %v1824_v32  ;;  %v1803_v48 = vmax.f32 %v1761_v56, %v1787_v47  ;;  %v1831_v62 = vmax.f32 %v1818_v17, 0.0 }
 0x305   : > { %v2308_v45 = vpop.f32.mrb[119].mxu1  ;;  %v1817_v39 = vadd.f32 %v3466_v38, %v1800_v10 }
 0x306   : > { %v1569_v4 = vadd.f32 %v2306_v19, %v3545_v7  ;;  %v2309_v18 = vadd.f32 %v2308_v45, %v2307_v25  ;;  %v1838_v60 = vadd.f32 %v1837_v22, %v1826_v61  ;;  %v1820_v9 = vadd.f32 %v3466_v38, %v1803_v48 }
 0x307   : > { %v1830_v41 = vmax.f32 %v1817_v39, 0.0  ;;  %v1832_v19 = vmax.f32 %v1819_v58, 0.0 }
 0x308   : > { %v1705_v11 = vadd.f32 %v3546_v52, %v1569_v4  ;;  %v1572_v8 = vadd.f32 %v2309_v18, %v3410_v1  ;;  %v1839_v44 = vadd.f32 %v1838_v60, %v1827_v57 }
 0x30a   : > { %1740 = vst [vmem:[#allocation3 + $0xb0] sm:$0xff] %v1705_v11  ;;  %v1708_v51 = vadd.f32 %v3547_v13, %v1572_v8  ;;  %v2310_v24 = vpop.f32.mrb[120].mxu1  ;;  %v1840_v34 = vadd.f32 %v1839_v44, %v1828_v53  ;;  %v1858_v13 = vrot.slane %v3463_v2, 2 }
 0x30b   : > { %v2311_v14 = vpop.f32.mrb[121].mxu1  ;;  %v1763_v28 = vld [vmem:[#allocation3 + $0xa0] ss:$2 sm:$0xff]  ;;  %v1789_v46 = vld [vmem:[#allocation3 + $0xa1] ss:$2 sm:$0xff] }
 0x30c   : > { %1741 = vst [vmem:[#allocation3 + $0xb8] sm:$0xff] %v1708_v51  ;;  %v2312_v1 = vadd.f32 %v2311_v14, %v2310_v24  ;;  %v2313_v21 = vpop.f32.mrb[122].mxu1  ;;  %v1804_v30 = vmax.f32 %v1763_v28, %v1789_v46  ;;  %v1841_v59 = vadd.f32 %v1840_v34, %v1829_v3 }
 0x30d   : > { %v2314_v16 = vpop.f32.mrb[123].mxu1 }
 0x30e   : > { %v1577_v37 = vadd.f32 %v2312_v1, %v3414_v36  ;;  %v1821_v54 = vadd.f32 %v3466_v38, %v1804_v30  ;;  %v1842_v25 = vadd.f32 %v1841_v59, %v1830_v41 }
 0x310   : > { %v1713_v55 = vadd.f32 %v3412_v35, %v1577_v37  ;;  %v1833_v35 = vmax.f32 %v1820_v9, 0.0  ;;  %v1843_v43 = vadd.f32 %v1842_v25, %v1831_v62  ;;  %v1834_v29 = vmax.f32 %v1821_v54, 0.0 }
 0x312   : > { %1742 = vst [vmem:[#allocation3 + $0xc0] sm:$0xff] %v1713_v55  ;;  %v1844_v4 = vadd.f32 %v1843_v43, %v1832_v19 }
 0x313   : > { %v1765_v49 = vld [vmem:[#allocation3 + $0xb0] ss:$2 sm:$0xff]  ;;  %v1791_v5 = vld [vmem:[#allocation3 + $0xb1] ss:$2 sm:$0xff] }
 0x314   : > { %v1805_v36 = vmax.f32 %v1765_v49, %v1791_v5  ;;  %v1845_v15 = vadd.f32 %v1844_v4, %v1833_v35 }
 0x316   : > { %v1822_v40 = vadd.f32 %v3466_v38, %v1805_v36  ;;  %v1846_v33 = vadd.f32 %v1845_v15, %v1834_v29 }
 0x318   : > { %v1835_v27 = vmax.f32 %v1822_v40, 0.0 }
 0x319   : > { %v1767_v45 = vld [vmem:[#allocation3 + $0xc0] ss:$2 sm:$0xf]  ;;  %v1793_v7 = vld [vmem:[#allocation3 + $0xc1] ss:$2 sm:$0xf] }
 0x31a   : > { %v1806_v18 = vmax.f32 %v1767_v45, %v1793_v7  ;;  %v1847_v52 = vadd.f32 %v1846_v33, %v1835_v27 }
 0x31c   : > { %v1823_v12 = vadd.f32 %v3466_v38, %v1806_v18 }
 0x31e   : > { %v1836_v63 = vmax.f32 %v1823_v12, 0.0 }
 0x320   : > { %v1849_v11 = vsel %vm1848_vm2, %v1836_v63, 0.0 }
 0x321   : > { %v1850_v8 = vadd.f32 %v1849_v11, %v1847_v52 }
 0x323   : > { %v1851_v26 = vrot.slane %v1850_v8, 4 }
 0x325   : > { %v1852_v6 = vadd.f32 %v1851_v26, %v1850_v8 }
 0x327   : > { %v1853_v32 = vrot.slane %v1852_v6, 2 }
 0x329   : > { %v1854_v10 = vadd.f32 %v1853_v32, %v1852_v6 }
 0x32b   : > { %v1855_v31 = vrot.slane %v1854_v10, 1 }
 0x32d   : > { %v1856_v61 = vadd.f32 %v1855_v31, %v1854_v10 }
 0x32f   : > { %2561 = vmatmul.mubr.f32.vlgmr.msra.gmra.mrb[124].mxu1 %v1856_v61 }
 0x402   : > { %v1926_v38 = vpop.f32.mrb[124].mxu1 }
 0x403   : > { %v1927_v51 = vadd.f32 %v1926_v38, %v1858_v13  ;;  %v2562_v24 = vpop.f32.mrb[125].mxu1 }
 0x405   : > { %1930 = vst [vmem:[%s162_s27] sm:$0x1] %v1927_v51 }
 0x406   : > { %2719 = shalt.err (!%p2716_p3)
}
 0x407   : > { %s2720_s9 = scalar_lea.hbm %s3494_s4, 16  ;;  %s2724_s17 = scalar_lea.hbm %s3539_s3, 32 }
 0x408   : > { %p2721_p4 = scmp.ne.s32.totalorder %s3494_s4, %s2720_s9  ;;  %p2725_p9 = scmp.lt.u32.totalorder %s3494_s4, %s3539_s3 }
 0x409   : > { %p2726_p10 = scmp.lt.u32.totalorder %s2724_s17, %s2720_s9  ;;  %p2728_p12 = scmp.lt.u32.totalorder %s2720_s9, %s3494_s4 }
 0x40a   : > { %p2722_p7 = pnand %p2721_p4, %p2832_p5 }
 0x40b   : > { %p2727_p11 = por %p2726_p10, %p2725_p9 }
 0x40c   : > { %p2723_p8 = pneg %p2722_p7 }
 0x40d   : > { %p2729_p13 = por %p2728_p12, %p2727_p11 }
 0x40f   : > { %p2730_p0 = pnand %p2729_p13, %p2723_p8 }
 0x411   : > { %2733 = shalt.err (!%p2730_p0)
}
 0x412   : > { %2594 = dma.vmem_to_hbm [thread:$0]  (%p2832_p5), %s3496_s28, 16, %s3494_s4, %s1932_s5  }
 0x413 PF: > { %p2600_p1 = scmp.ge.s32.totalorder %s2768_s15, 2  ;;  %s1956_s24 = sand.u32 1, %s2756_s12  }
 0x414   : > { %s1957_s25 = scalar_lea.sflag [#allocation5], %s1956_s24 }
 0x415   : > { %p2597_p2 = pnand %p2600_p1, %p2836_p6 }
 0x417   : > { %2751 = dma.done.wait (!%p2597_p2), %s1957_s25, 16  }
 0x418   : > { %2753 = vsyncadd (!%p2597_p2), %s1957_s25, 4294967280  ;;  %p13_p3 = scmp.ge.s32.totalorder %s2819_s18, 4   ;;  %s3548_s12 = smov %s2760_s13 }
 0x419   : > { %s3549_s13 = smov %s2764_s14  ;;  %s3550_s14 = smov %s2830_s21 }
 0x41a   : > { %s3551_s15 = smov %s2819_s18  ;;  %15 = sbr.rel (!%p13_p3) target bundleno = 3 (0x3), region = 92 }
 0x421   :  { %1961 = vsyncpa [#allocation5], 1 }
 0x422   :  { %1963 = vsyncpa [#allocation5 + $0x1], 1 }

</bundles_post_ra>
